<compile_context>
chip_gen: v7x
topology: tpu7x:2x2x1
jax: 0.10.0
libtpu: 0.0.40
codegen_flags: <defaults>
</compile_context>

<pallas_src>
import math

import jax
import jax.numpy as jnp
from jax.experimental import pallas as pl
from jax.experimental.pallas import tpu as pltpu


IN_FEATURES = 784
HIDDEN = 600
OUT_FEATURES = 2
PRIOR_VAR = 0.05
SIGMA = math.sqrt(PRIOR_VAR)

K_PAD = 896      # 7 * 128
H_PAD = 640      # 5 * 128
OUT_PAD = 128    # 1 * 128
NEG_INF = -1e30


def _round_up(x, m):
    return ((x + m - 1) // m) * m


def _gdropconnect_kernel(x_ref, w1_ref, w2_ref, out_ref):
    """Fused per-batch-tile: (x @ W1eff) -> relu -> (@ W2eff) -> masked log_softmax."""
    # fc1: bf16 x bf16 on the MXU, f32 accumulation. Noise already folded into W1eff.
    h = jnp.dot(x_ref[...], w1_ref[...],
                preferred_element_type=jnp.float32)          # (TB, 640) f32
    h = jnp.maximum(h, 0.0)                                   # relu

    # fc2: tiny (640 x 128, only first 2 cols real), keep in f32.
    logits = jnp.dot(h, w2_ref[...],
                     preferred_element_type=jnp.float32)      # (TB, 128) f32

    # Mask the 126 padded logit lanes to a huge negative so log_softmax over the
    # real 2 classes is exact even when both real logits are negative.
    col = jax.lax.broadcasted_iota(jnp.int32, logits.shape, 1)
    logits = jnp.where(col < OUT_FEATURES, logits, NEG_INF)

    # log_softmax over the lane axis.
    m = jnp.max(logits, axis=-1, keepdims=True)
    shifted = logits - m
    lse = jnp.log(jnp.sum(jnp.exp(shifted), axis=-1, keepdims=True))
    out_ref[...] = shifted - lse


def gdropconnect_net_forward(x, w1, n1, w2, n2):
    """x: any shape reshapable to (-1, 784); w1:(600,784), w2:(2,600); n*: same shapes as w*."""
    x2d = x.reshape(-1, IN_FEATURES).astype(jnp.float32)      # x.view(-1, 784)
    B = x2d.shape[0]

    # Batch tile: >= 8 (sublane), up to 512 for good pipelining on large batches.
    TB = min(512, _round_up(B, 8))
    B_pad = _round_up(B, TB)
    grid = (B_pad // TB,)

    # Fold noise into weights once, transpose, zero-pad to lane-dense shapes.
    w1_eff = jnp.pad((w1 + n1).T.astype(jnp.float32),
                     ((0, K_PAD - IN_FEATURES), (0, H_PAD - HIDDEN)))   # (896, 640)
    w2_eff = jnp.pad((w2 + n2).T.astype(jnp.float32),
                     ((0, H_PAD - HIDDEN), (0, OUT_PAD - OUT_FEATURES)))  # (640, 128)

    x_pad = jnp.pad(x2d, ((0, B_pad - B), (0, K_PAD - IN_FEATURES)))     # (B_pad, 896)

    # bf16 for the dominant fc1 matmul (MXU-native); fc2 stays f32 (tiny, exact).
    x_pad = x_pad.astype(jnp.bfloat16)
    w1_eff = w1_eff.astype(jnp.bfloat16)
    w2_eff = w2_eff.astype(jnp.float32)

    cost = pl.CostEstimate(
        flops=2 * B_pad * (K_PAD * H_PAD + H_PAD * OUT_PAD),
        transcendentals=B_pad * OUT_PAD,
        bytes_accessed=(x_pad.size * 2 + w1_eff.size * 2 + w2_eff.size * 4
                        + B_pad * OUT_PAD * 4),
    )

    out_full = pl.pallas_call(
        _gdropconnect_kernel,
        out_shape=jax.ShapeDtypeStruct((B_pad, OUT_PAD), jnp.float32),
        grid=grid,
        in_specs=[
            pl.BlockSpec((TB, K_PAD), lambda i: (i, 0)),     # x tile (pipelined)
            pl.BlockSpec((K_PAD, H_PAD), lambda i: (0, 0)),  # W1eff resident
            pl.BlockSpec((H_PAD, OUT_PAD), lambda i: (0, 0)),  # W2eff resident
        ],
        out_specs=pl.BlockSpec((TB, OUT_PAD), lambda i: (i, 0)),
        compiler_params=pltpu.CompilerParams(
            dimension_semantics=("parallel",),
            vmem_limit_bytes=32 << 20,
        ),
        cost_estimate=cost,
    )(x_pad, w1_eff, w2_eff)

    # Drop padded batch rows and padded logit lanes.
    return out_full[:B, :OUT_FEATURES]


def _reference_forward(x, w1, n1, w2, n2):
    """Pure-JAX reference using the same bf16 cast on the fc1 operands."""
    x2d = x.reshape(-1, IN_FEATURES).astype(jnp.float32)
    xb = x2d.astype(jnp.bfloat16).astype(jnp.float32)
    w1b = (w1 + n1).astype(jnp.bfloat16).astype(jnp.float32)
    h = jnp.maximum(xb @ w1b.T, 0.0)
    logits = h @ (w2 + n2).T
    return jax.nn.log_softmax(logits, axis=1)


if __name__ == "__main__":
    key = jax.random.PRNGKey(0)
    k_x, k_w1, k_w2, k_n1, k_n2 = jax.random.split(key, 5)

    # Deterministic parameter init, matching PyTorch reset_parameters:
    #   uniform(-stdv, stdv) with stdv = 1/sqrt(in_features); bias=False.
    stdv1 = 1.0 / math.sqrt(IN_FEATURES)
    stdv2 = 1.0 / math.sqrt(HIDDEN)
    w1 = jax.random.uniform(k_w1, (HIDDEN, IN_FEATURES), jnp.float32, -stdv1, stdv1)
    w2 = jax.random.uniform(k_w2, (OUT_FEATURES, HIDDEN), jnp.float32, -stdv2, stdv2)

    # DropConnect additive Gaussian weight noise: sigma * randn_like(weight).
    # (Generated deterministically in host-side glue; folded into W in the wrapper.)
    n1 = SIGMA * jax.random.normal(k_n1, (HIDDEN, IN_FEATURES), jnp.float32)
    n2 = SIGMA * jax.random.normal(k_n2, (OUT_FEATURES, HIDDEN), jnp.float32)

    # Small MNIST-like input batch: (batch=2, 1, 28, 28) -> view(-1, 784).
    x = jax.random.normal(k_x, (2, 1, 28, 28), jnp.float32)

    out = gdropconnect_net_forward(x, w1, n1, w2, n2)
    out = jax.block_until_ready(out)

    ref = _reference_forward(x, w1, n1, w2, n2)
    assert out.shape == (2, OUT_FEATURES), out.shape
    assert jnp.allclose(out, ref, atol=5e-3, rtol=5e-3), (out, ref)
    # log_softmax rows must (log-)sum to 1.
    assert jnp.allclose(jnp.sum(jnp.exp(out), axis=1), 1.0, atol=1e-4)

    print("KERNEL_OK")
</pallas_src>

<mosaic_0001>
module attributes {stable_mosaic.version = 11 : i64} {
  func.func @_gdropconnect_kernel(%arg0: i32, %arg1: memref<8x896xbf16, #tpu.memory_space<vmem>>, %arg2: memref<896x640xbf16, #tpu.memory_space<vmem>>, %arg3: memref<640x128xf32, #tpu.memory_space<vmem>>, %arg4: memref<8x128xf32, #tpu.memory_space<vmem>>) attributes {dimension_semantics = [#tpu.dimension_semantics<parallel>], iteration_bounds = array<i64: 1>, scalar_prefetch = 0 : i64, scratch_operands = 0 : i64, tpu.core_type = #tpu.core_type<tc>, window_params = [{transform_indices = @transform_0, window_bounds = array<i64: 8, 896>}, {pipeline_mode = #tpu.pipeline_mode<synchronous>, transform_indices = @transform_1, window_bounds = array<i64: 896, 640>}, {pipeline_mode = #tpu.pipeline_mode<synchronous>, transform_indices = @transform_2, window_bounds = array<i64: 640, 128>}, {transform_indices = @transform_3, window_bounds = array<i64: 8, 128>}]} {
    %c0 = arith.constant 0 : index
    %c0_0 = arith.constant 0 : index
    %0 = vector.load %arg1[%c0, %c0_0] : memref<8x896xbf16, #tpu.memory_space<vmem>>, vector<8x896xbf16>
    %c0_1 = arith.constant 0 : index
    %c0_2 = arith.constant 0 : index
    %1 = vector.load %arg2[%c0_1, %c0_2] : memref<896x640xbf16, #tpu.memory_space<vmem>>, vector<896x640xbf16>
    %cst = arith.constant dense<0.000000e+00> : vector<8x640xf32>
    %2 = tpu.matmul %0, %1, %cst {dimension_numbers = #tpu.dot_dimension_numbers<[1], [0], [0], [1], [0, 0, 1, 1], [], []>} : vector<8x896xbf16>, vector<896x640xbf16>, vector<8x640xf32> -> vector<8x640xf32>
    %cst_3 = arith.constant 0.000000e+00 : f32
    %3 = vector.broadcast %cst_3 : f32 to vector<8x640xf32>
    %4 = arith.maximumf %2, %3 : vector<8x640xf32>
    %c0_4 = arith.constant 0 : index
    %c0_5 = arith.constant 0 : index
    %5 = vector.load %arg3[%c0_4, %c0_5] : memref<640x128xf32, #tpu.memory_space<vmem>>, vector<640x128xf32>
    %cst_6 = arith.constant dense<0.000000e+00> : vector<8x128xf32>
    %6 = tpu.matmul %4, %5, %cst_6 {dimension_numbers = #tpu.dot_dimension_numbers<[1], [0], [0], [1], [0, 0, 1, 1], [], []>} : vector<8x640xf32>, vector<640x128xf32>, vector<8x128xf32> -> vector<8x128xf32>
    %7 = tpu.iota {dimensions = array<i32: 1>} : vector<8x128xi32>
    %c2_i32 = arith.constant 2 : i32
    %8 = vector.broadcast %c2_i32 : i32 to vector<8x128xi32>
    %9 = arith.cmpi slt, %7, %8 : vector<8x128xi32>
    %cst_7 = arith.constant -1.000000e+30 : f32
    %10 = vector.broadcast %cst_7 : f32 to vector<8x128xf32>
    %11 = arith.select %9, %6, %10 : vector<8x128xi1>, vector<8x128xf32>
    %cst_8 = arith.constant dense<0xFF800000> : vector<8xf32>
    %12 = vector.multi_reduction <maximumf>, %11, %cst_8 [1] : vector<8x128xf32> to vector<8xf32>
    %13 = vector.shape_cast %12 : vector<8xf32> to vector<8x1xf32>
    %14 = vector.broadcast %13 : vector<8x1xf32> to vector<8x128xf32>
    %15 = arith.subf %11, %14 : vector<8x128xf32>
    %16 = math.exp %15 : vector<8x128xf32>
    %cst_9 = arith.constant dense<0.000000e+00> : vector<8xf32>
    %17 = vector.multi_reduction <add>, %16, %cst_9 [1] : vector<8x128xf32> to vector<8xf32>
    %18 = vector.shape_cast %17 : vector<8xf32> to vector<8x1xf32>
    %19 = math.log %18 : vector<8x1xf32>
    %20 = vector.broadcast %19 : vector<8x1xf32> to vector<8x128xf32>
    %21 = arith.subf %15, %20 : vector<8x128xf32>
    %c0_10 = arith.constant 0 : index
    %c0_11 = arith.constant 0 : index
    %22 = vector.load %arg4[%c0_10, %c0_11] : memref<8x128xf32, #tpu.memory_space<vmem>>, vector<8x128xf32>
    tpu.vector_store %arg4[%c0_10, %c0_11], %21 {strides = array<i32>} : memref<8x128xf32, #tpu.memory_space<vmem>>, vector<8x128xf32>,
    return
  }
  func.func @transform_0(%arg0: i32) -> (i32, i32) {
    %c0_i32 = arith.constant 0 : i32
    %c0_i32_0 = arith.constant 0 : i32
    return %arg0, %c0_i32 : i32, i32
  }
  func.func @transform_1(%arg0: i32) -> (i32, i32) {
    %c0_i32 = arith.constant 0 : i32
    %c0_i32_0 = arith.constant 0 : i32
    %c0_i32_1 = arith.constant 0 : i32
    return %c0_i32, %c0_i32_0 : i32, i32
  }
  func.func @transform_2(%arg0: i32) -> (i32, i32) {
    %c0_i32 = arith.constant 0 : i32
    %c0_i32_0 = arith.constant 0 : i32
    %c0_i32_1 = arith.constant 0 : i32
    return %c0_i32, %c0_i32_0 : i32, i32
  }
  func.func @transform_3(%arg0: i32) -> (i32, i32) {
    %c0_i32 = arith.constant 0 : i32
    %c0_i32_0 = arith.constant 0 : i32
    return %arg0, %c0_i32 : i32, i32
  }
}

</mosaic_0001>

<bundles_post_ra>
// kernel: tpu_custom_call.1
= control target key start
LH: loop header
LB: loop body
LE: loop exit
PB: predicated region body
PF: predicated region fallthrough
CT: control target
= control target key end

     0   :  { %8 = vsyncpa [#allocation3], 0  ;;  %s3954_s0 = inlined_call_operand.hbm [shape: bf16[8,896], index: 0, kind: input, shape index: {}]   ;;  %s3955_s1 = inlined_call_operand.hbm [shape: bf16[896,640], index: 1, kind: input, shape index: {}]   ;;  %s3956_s2 = inlined_call_operand.hbm [shape: f32[640,128], index: 2, kind: input, shape index: {}]   ;;  %s3957_s3 = inlined_call_operand.hbm [shape: f32[8,128], index: 3, kind: output, shape index: {}]  }
   0x1   :  { %9 = vsyncpa [#allocation6], 0 }
   0x2   :  { %10 = vsyncpa [#allocation4], 0  ;;  %s3815_s12 = smov [#allocation5]   ;;  %s3721_s16 = scalar_lea.hbm %s3955_s1, 35840 }
   0x3   :  { %s26_s13 = sshll.u32 %s3815_s12, 4  ;;  %p3722_p0 = scmp.ne.s32.totalorder %s3955_s1, %s3721_s16  ;;  %s27_s13 = int_to_ptr.vmem [resolvable:$true] %s26_s13 }
   0x4   :  { %p3725_p1 = scmp.lt.u32.totalorder %s3721_s16, %s3955_s1 }
   0x6   :  { %p3727_p2 = pnand %p3725_p1, %p3722_p0 }
   0x8   :  { %3730 = shalt.err (!%p3727_p2)
}
   0x9   :  { %s3731_s21 = scalar_lea.vmem %s27_s13, 35840  ;;  %p3736_p4 = scmp.lt.s32.totalorder %s27_s13, %s27_s13 }
   0xa   :  { %p3732_p3 = scmp.ne.s32.totalorder %s27_s13, %s3731_s21  ;;  %p3737_p5 = scmp.lt.s32.totalorder %s3731_s21, %s3731_s21 }
   0xc   :  { %p3738_p6 = por %p3737_p5, %p3736_p4 }
   0xe   :  { %p3739_p7 = pnand %p3738_p6, %p3732_p3 }
  0x10   :  { %3742 = shalt.err (!%p3739_p7)
}
  0x11   :  { %s3816_s22 = smov 320   ;;  %s3817_s23 = smov 20  }
  0x12   :  { %32 = dma.hbm_to_vmem [thread:$0]  %s3955_s1, 35840, %s27_s13, [#allocation6], %s3816_s22, %s3816_s22, %s3817_s23  }
  0x13   :  { %s3818_s26 = smov [#allocation2]   ;;  %s3819_s28 = smov [#allocation7]  }
  0x14   :  { %s17_s27 = sshll.u32 %s3818_s26, 4  ;;  %s38_s29 = sshll.u32 %s3819_s28, 4  ;;  %s18_s27 = int_to_ptr.vmem [resolvable:$true] %s17_s27  ;;  %s39_s29 = int_to_ptr.vmem [resolvable:$true] %s38_s29 }
  0x15   :  { %s3743_s5 = scalar_lea.hbm %s3954_s0, 448 }
  0x16   :  { %p3744_p8 = scmp.ne.s32.totalorder %s3954_s0, %s3743_s5  ;;  %p3747_p9 = scmp.lt.u32.totalorder %s3743_s5, %s3954_s0 }
  0x18   :  { %p3749_p10 = pnand %p3747_p9, %p3744_p8 }
  0x1a   :  { %3752 = shalt.err (!%p3749_p10)
}
  0x1b   :  { %s3753_s1 = scalar_lea.vmem %s18_s27, 448  ;;  %p3758_p12 = scmp.lt.s32.totalorder %s18_s27, %s18_s27 }
  0x1c   :  { %p3754_p11 = scmp.ne.s32.totalorder %s18_s27, %s3753_s1  ;;  %p3759_p13 = scmp.lt.s32.totalorder %s3753_s1, %s3753_s1 }
  0x1e   :  { %p3760_p0 = por %p3759_p13, %p3758_p12 }
  0x20   :  { %p3761_p1 = pnand %p3760_p0, %p3754_p11 }
  0x22   :  { %3764 = shalt.err (!%p3761_p1)
}
  0x23   :  { %20 = dma.hbm_to_vmem [thread:$0]  %s3954_s0, 448, %s18_s27, [#allocation3]  }
  0x24   :  { %s3765_s14 = scalar_lea.hbm %s3956_s2, 10240 }
  0x25   :  { %p3766_p2 = scmp.ne.s32.totalorder %s3956_s2, %s3765_s14  ;;  %p3769_p3 = scmp.lt.u32.totalorder %s3765_s14, %s3956_s2 }
  0x27   :  { %p3771_p4 = pnand %p3769_p3, %p3766_p2 }
  0x29   :  { %3774 = shalt.err (!%p3771_p4)
}
  0x2a   :  { %s3775_s19 = scalar_lea.vmem %s39_s29, 10240  ;;  %p3780_p6 = scmp.lt.s32.totalorder %s39_s29, %s39_s29 }
  0x2b   :  { %p3776_p5 = scmp.ne.s32.totalorder %s39_s29, %s3775_s19  ;;  %p3781_p7 = scmp.lt.s32.totalorder %s3775_s19, %s3775_s19 }
  0x2d   :  { %p3782_p8 = por %p3781_p7, %p3780_p6 }
  0x2f   :  { %p3783_p9 = pnand %p3782_p8, %p3776_p5 }
  0x31   :  { %3786 = shalt.err (!%p3783_p9)
}
  0x32   :  { %s3820_s0 = smov 128   ;;  %s3821_s20 = smov 8  }
  0x33   :  { %44 = dma.hbm_to_vmem [thread:$0]  %s3956_s2, 10240, %s39_s29, [#allocation6], %s3820_s0, %s3820_s0, %s3821_s20  }
  0x34   :  { %3809 = dma.done.wait [#allocation3], 448  }
  0x35   :  { %3810 = vsyncadd [#allocation3], 4294966848 }
  0x36   :  { %3811 = dma.done.wait [#allocation6], 46080  }
  0x37   :  { %3812 = vsyncadd [#allocation6], 4294921216  ;;  %v3318_v0 = vld [vmem:[#allocation5 + $0x4] ss:$20 sps:$4 sm:$0xff]   ;;  %v3320_v1 = vld [vmem:[#allocation5 + $0xc] ss:$20 sps:$4 sm:$0xff]  }
  0x38   :  { %1876 = vmatprep.subr.bf16.mxu0 %v3318_v0  ;;  %v3322_v2 = vld [vmem:[#allocation5] ss:$20 sps:$4 sm:$0xff]   ;;  %v3323_v3 = vld [vmem:[#allocation5 + $0x8] ss:$20 sps:$4 sm:$0xff]   ;;  %2040 = vmatprep.subr.bf16.mxu1 %v3320_v1  ;;  %v3329_v7 = vld [vmem:[#allocation5 + $0x30] ss:$20 sps:$4 sm:$0xff]  }
  0x39   :  { %v3324_v4 = vld [vmem:[#allocation5 + $0x2c] ss:$20 sps:$4 sm:$0xff]   ;;  %1877 = vmatpush1.bf16.msra.mxu0 %v3322_v2  ;;  %2041 = vmatpush1.bf16.msra.mxu1 %v3323_v3  ;;  %v3326_v5 = vld [vmem:[#allocation5 + $0x34] ss:$20 sps:$4 sm:$0xff]   ;;  %v3332_v9 = vld [vmem:[#allocation5 + $0x5c] ss:$20 sps:$4 sm:$0xff]  }
  0x3a   :  { %v3328_v6 = vld [vmem:[#allocation5 + $0x28] ss:$20 sps:$4 sm:$0xff]   ;;  %1878 = vmatprep.subr.bf16.mxu0 %v3324_v4  ;;  %2042 = vmatprep.subr.bf16.mxu1 %v3326_v5  ;;  %v3334_v10 = vld [vmem:[#allocation5 + $0x50] ss:$20 sps:$4 sm:$0xff]   ;;  %v3335_v11 = vld [vmem:[#allocation5 + $0x58] ss:$20 sps:$4 sm:$0xff]  }
  0x3b   :  { %v3330_v8 = vld [vmem:[#allocation5 + $0x54] ss:$20 sps:$4 sm:$0xff]   ;;  %v3336_v12 = vld [vmem:[#allocation5 + $0x7c] ss:$20 sps:$4 sm:$0xff]   ;;  %v3338_v13 = vld [vmem:[#allocation5 + $0x84] ss:$20 sps:$4 sm:$0xff]  }
  0x3c   :  { %v3340_v14 = vld [vmem:[#allocation5 + $0x78] ss:$20 sps:$4 sm:$0xff]   ;;  %v3341_v15 = vld [vmem:[#allocation5 + $0x80] ss:$20 sps:$4 sm:$0xff]   ;;  %v3347_v19 = vld [vmem:[#allocation5 + $0xa8] ss:$20 sps:$4 sm:$0xff]  }
  0x3d   :  { %1879 = vmatpush1.bf16.msra.mxu0 %v3328_v6  ;;  %2043 = vmatpush1.bf16.msra.mxu1 %v3329_v7  ;;  %v3342_v16 = vld [vmem:[#allocation5 + $0xa4] ss:$20 sps:$4 sm:$0xff]   ;;  %v3344_v17 = vld [vmem:[#allocation5 + $0xac] ss:$20 sps:$4 sm:$0xff]   ;;  %v3350_v21 = vld [vmem:[#allocation5 + $0xd4] ss:$20 sps:$4 sm:$0xff]  }
  0x3e   :  { %1880 = vmatprep.subr.bf16.mxu0 %v3330_v8  ;;  %2044 = vmatprep.subr.bf16.mxu1 %v3332_v9  ;;  %v3346_v18 = vld [vmem:[#allocation5 + $0xa0] ss:$20 sps:$4 sm:$0xff]   ;;  %v3352_v22 = vld [vmem:[#allocation5 + $0xc8] ss:$20 sps:$4 sm:$0xff]   ;;  %v3353_v23 = vld [vmem:[#allocation5 + $0xd0] ss:$20 sps:$4 sm:$0xff]  }
  0x3f   :  { %v3348_v20 = vld [vmem:[#allocation5 + $0xcc] ss:$20 sps:$4 sm:$0xff]   ;;  %v3354_v24 = vld [vmem:[#allocation5 + $0xf4] ss:$20 sps:$4 sm:$0xff]   ;;  %v3356_v25 = vld [vmem:[#allocation5 + $0xfc] ss:$20 sps:$4 sm:$0xff]  }
  0x40   :  { %v3358_v26 = vld [vmem:[#allocation5 + $0xf0] ss:$20 sps:$4 sm:$0xff]   ;;  %v3359_v27 = vld [vmem:[#allocation5 + $0xf8] ss:$20 sps:$4 sm:$0xff]   ;;  %v3365_v31 = vld [vmem:[#allocation5 + $0x120] ss:$20 sps:$4 sm:$0xff]  }
  0x41   :  { %1881 = vmatpush1.bf16.msra.mxu0 %v3334_v10  ;;  %2045 = vmatpush1.bf16.msra.mxu1 %v3335_v11  ;;  %v3360_v28 = vld [vmem:[#allocation5 + $0x11c] ss:$20 sps:$4 sm:$0xff]   ;;  %v3362_v29 = vld [vmem:[#allocation5 + $0x124] ss:$20 sps:$4 sm:$0xff]   ;;  %v3368_v33 = vld [vmem:[#allocation5 + $0x14c] ss:$20 sps:$4 sm:$0xff]  }
  0x42   :  { %1882 = vmatprep.subr.bf16.mxu0 %v3336_v12  ;;  %2046 = vmatprep.subr.bf16.mxu1 %v3338_v13  ;;  %v3364_v30 = vld [vmem:[#allocation5 + $0x118] ss:$20 sps:$4 sm:$0xff]   ;;  %v3370_v34 = vld [vmem:[#allocation5 + $0x140] ss:$20 sps:$4 sm:$0xff]   ;;  %v3371_v35 = vld [vmem:[#allocation5 + $0x148] ss:$20 sps:$4 sm:$0xff]  }
  0x43   :  { %v3366_v32 = vld [vmem:[#allocation5 + $0x144] ss:$20 sps:$4 sm:$0xff]   ;;  %v3372_v36 = vld [vmem:[#allocation5 + $0x16c] ss:$20 sps:$4 sm:$0xff]   ;;  %v3374_v37 = vld [vmem:[#allocation5 + $0x174] ss:$20 sps:$4 sm:$0xff]  }
  0x44   :  { %v3376_v38 = vld [vmem:[#allocation5 + $0x168] ss:$20 sps:$4 sm:$0xff]   ;;  %v3377_v39 = vld [vmem:[#allocation5 + $0x170] ss:$20 sps:$4 sm:$0xff]   ;;  %v3383_v43 = vld [vmem:[#allocation5 + $0x198] ss:$20 sps:$4 sm:$0xff]  }
  0x45   :  { %1883 = vmatpush1.bf16.msra.mxu0 %v3340_v14  ;;  %2047 = vmatpush1.bf16.msra.mxu1 %v3341_v15  ;;  %v3378_v40 = vld [vmem:[#allocation5 + $0x194] ss:$20 sps:$4 sm:$0xff]   ;;  %v3380_v41 = vld [vmem:[#allocation5 + $0x19c] ss:$20 sps:$4 sm:$0xff]   ;;  %v3386_v45 = vld [vmem:[#allocation5 + $0x1c4] ss:$20 sps:$4 sm:$0xff]  }
  0x46   :  { %1884 = vmatprep.subr.bf16.mxu0 %v3342_v16  ;;  %2048 = vmatprep.subr.bf16.mxu1 %v3344_v17  ;;  %v3382_v42 = vld [vmem:[#allocation5 + $0x190] ss:$20 sps:$4 sm:$0xff]   ;;  %v3388_v47 = vld [vmem:[#allocation5 + $0x1b8] ss:$20 sps:$4 sm:$0xff]   ;;  %v3389_v49 = vld [vmem:[#allocation5 + $0x1c0] ss:$20 sps:$4 sm:$0xff]  }
  0x47   :  { %v3384_v44 = vld [vmem:[#allocation5 + $0x1bc] ss:$20 sps:$4 sm:$0xff]   ;;  %v55_v46 = vld [vmem:[#allocation2] sm:$0xff]  ;;  %v3392_v51 = vld [vmem:[#allocation5 + $0x1ec] ss:$20 sps:$4 sm:$0xff]   ;;  %vm3824_vm0 = vmmov 0  }
  0x48   :  { %v3883_v48 = vcombine.high %v55_v46, %v55_v46  ;;  %v3390_v50 = vld [vmem:[#allocation5 + $0x1e4] ss:$20 sps:$4 sm:$0xff]   ;;  %v3394_v52 = vld [vmem:[#allocation5 + $0x1e0] ss:$20 sps:$4 sm:$0xff]   ;;  %v3395_v53 = vld [vmem:[#allocation5 + $0x1e8] ss:$20 sps:$4 sm:$0xff]   ;;  %v3887_v5 = vcombine.low %v55_v46, %v55_v46 }
  0x49   :  { %1885 = vmatpush1.bf16.msra.mxu0 %v3346_v18  ;;  %2049 = vmatpush1.bf16.msra.mxu1 %v3347_v19  ;;  %v3396_v54 = vld [vmem:[#allocation5 + $0x20c] ss:$20 sps:$4 sm:$0xff]   ;;  %v3398_v55 = vld [vmem:[#allocation5 + $0x214] ss:$20 sps:$4 sm:$0xff]   ;;  %v3401_v57 = vld [vmem:[#allocation5 + $0x210] ss:$20 sps:$4 sm:$0xff]  }
  0x4a   :  { %1886 = vmatprep.subr.bf16.mxu0 %v3348_v20  ;;  %2050 = vmatprep.subr.bf16.mxu1 %v3350_v21  ;;  %v3400_v56 = vld [vmem:[#allocation5 + $0x208] ss:$20 sps:$4 sm:$0xff]   ;;  %v3406_v60 = vld [vmem:[#allocation5 + $0x230] ss:$20 sps:$4 sm:$0xff]   ;;  %v3407_v61 = vld [vmem:[#allocation5 + $0x238] ss:$20 sps:$4 sm:$0xff]  }
  0x4b   :  { %1908 = vmatprep.mubr.bf16.mxu0 %v3883_v48  ;;  %2072 = vmatprep.mubr.bf16.mxu1 %v3883_v48  ;;  %v3402_v58 = vld [vmem:[#allocation5 + $0x234] ss:$20 sps:$4 sm:$0xff]   ;;  %v3404_v59 = vld [vmem:[#allocation5 + $0x23c] ss:$20 sps:$4 sm:$0xff]   ;;  %v3410_v63 = vld [vmem:[#allocation5 + $0x264] ss:$20 sps:$4 sm:$0xff]  }
  0x4c   :  { %v3408_v62 = vld [vmem:[#allocation5 + $0x25c] ss:$20 sps:$4 sm:$0xff]   ;;  %v3412_v0 = vld [vmem:[#allocation5 + $0x258] ss:$20 sps:$4 sm:$0xff]   ;;  %v3413_v1 = vld [vmem:[#allocation5 + $0x260] ss:$20 sps:$4 sm:$0xff]  }
  0x4d   :  { %1887 = vmatpush1.bf16.msra.mxu0 %v3352_v22  ;;  %2051 = vmatpush1.bf16.msra.mxu1 %v3353_v23  ;;  %v3417_v2 = vld [vmem:[#allocation5 + $0x284] ss:$20 sps:$4 sm:$0xff]   ;;  %v3420_v3 = vld [vmem:[#allocation5 + $0x28c] ss:$20 sps:$4 sm:$0xff]   ;;  %v3418_v6 = vld [vmem:[#allocation5 + $0x288] ss:$20 sps:$4 sm:$0xff]  }
  0x4e   :  { %1888 = vmatprep.subr.bf16.mxu0 %v3354_v24  ;;  %2052 = vmatprep.subr.bf16.mxu1 %v3356_v25  ;;  %v3415_v4 = vld [vmem:[#allocation5 + $0x280] ss:$20 sps:$4 sm:$0xff]   ;;  %v3422_v9 = vld [vmem:[#allocation5 + $0x2a8] ss:$20 sps:$4 sm:$0xff]   ;;  %v3425_v10 = vld [vmem:[#allocation5 + $0x2b0] ss:$20 sps:$4 sm:$0xff]  }
  0x4f   :  { %v3424_v7 = vld [vmem:[#allocation5 + $0x2ac] ss:$20 sps:$4 sm:$0xff]   ;;  %v3427_v8 = vld [vmem:[#allocation5 + $0x2b4] ss:$20 sps:$4 sm:$0xff]   ;;  %v3433_v12 = vld [vmem:[#allocation5 + $0x2dc] ss:$20 sps:$4 sm:$0xff]  }
  0x50   :  { %v3430_v11 = vld [vmem:[#allocation5 + $0x2d4] ss:$20 sps:$4 sm:$0xff]   ;;  %v3428_v13 = vld [vmem:[#allocation5 + $0x2d0] ss:$20 sps:$4 sm:$0xff]   ;;  %v3431_v14 = vld [vmem:[#allocation5 + $0x2d8] ss:$20 sps:$4 sm:$0xff]  }
  0x51   :  { %1889 = vmatpush1.bf16.msra.mxu0 %v3358_v26  ;;  %2053 = vmatpush1.bf16.msra.mxu1 %v3359_v27  ;;  %v3436_v15 = vld [vmem:[#allocation5 + $0x2fc] ss:$20 sps:$4 sm:$0xff]   ;;  %v3439_v16 = vld [vmem:[#allocation5 + $0x304] ss:$20 sps:$4 sm:$0xff]   ;;  %v3437_v18 = vld [vmem:[#allocation5 + $0x300] ss:$20 sps:$4 sm:$0xff]  }
  0x52   :  { %1890 = vmatprep.subr.bf16.mxu0 %v3360_v28  ;;  %2054 = vmatprep.subr.bf16.mxu1 %v3362_v29  ;;  %v3434_v17 = vld [vmem:[#allocation5 + $0x2f8] ss:$20 sps:$4 sm:$0xff]   ;;  %v3440_v21 = vld [vmem:[#allocation5 + $0x320] ss:$20 sps:$4 sm:$0xff]   ;;  %v3443_v22 = vld [vmem:[#allocation5 + $0x328] ss:$20 sps:$4 sm:$0xff]  }
  0x53   :  { %v3442_v19 = vld [vmem:[#allocation5 + $0x324] ss:$20 sps:$4 sm:$0xff]   ;;  %v3445_v20 = vld [vmem:[#allocation5 + $0x32c] ss:$20 sps:$4 sm:$0xff]   ;;  %v3451_v24 = vld [vmem:[#allocation5 + $0x354] ss:$20 sps:$4 sm:$0xff]  }
  0x54   :  { %v3448_v23 = vld [vmem:[#allocation5 + $0x34c] ss:$20 sps:$4 sm:$0xff]   ;;  %v3446_v25 = vld [vmem:[#allocation5 + $0x348] ss:$20 sps:$4 sm:$0xff]   ;;  %v3449_v26 = vld [vmem:[#allocation5 + $0x350] ss:$20 sps:$4 sm:$0xff]  }
  0x55   :  { %1891 = vmatpush1.bf16.msra.mxu0 %v3364_v30  ;;  %2055 = vmatpush1.bf16.msra.mxu1 %v3365_v31  ;;  %v3454_v27 = vld [vmem:[#allocation5 + $0x374] ss:$20 sps:$4 sm:$0xff]   ;;  %v3457_v28 = vld [vmem:[#allocation5 + $0x37c] ss:$20 sps:$4 sm:$0xff]   ;;  %s3826_s2 = smov [#allocation8]  }
  0x56   :  { %1892 = vmatprep.subr.bf16.mxu0 %v3366_v32  ;;  %2056 = vmatprep.subr.bf16.mxu1 %v3368_v33  ;;  %v3891_v29 = vld [vmem:[#allocation2 + $0x8] sm:$0xff]  ;;  %s2680_s23 = sshll.u32 %s3826_s2, 4  ;;  %s2681_s23 = int_to_ptr.vmem [resolvable:$true] %s2680_s23 }
  0x57   :  { %v3895_v30 = vcombine.high %v3891_v29, %v3891_v29  ;;  %v3452_v31 = vld [vmem:[#allocation5 + $0x370] ss:$20 sps:$4 sm:$0xff]   ;;  %v3455_v32 = vld [vmem:[#allocation5 + $0x378] ss:$20 sps:$4 sm:$0xff]   ;;  %s3787_s24 = scalar_lea.vmem %s2681_s23, 128  ;;  %p3792_p11 = scmp.lt.s32.totalorder %s2681_s23, %s2681_s23 }
  0x58   :  { %v3460_v33 = vld [vmem:[#allocation5 + $0x39c] ss:$20 sps:$4 sm:$0xff]   ;;  %p3788_p10 = scmp.ne.s32.totalorder %s2681_s23, %s3787_s24  ;;  %p3793_p12 = scmp.lt.s32.totalorder %s3787_s24, %s3787_s24 }
  0x59   :  { %1893 = vmatpush1.bf16.msra.mxu0 %v3370_v34  ;;  %2057 = vmatpush1.bf16.msra.mxu1 %v3371_v35  ;;  %v3463_v34 = vld [vmem:[#allocation5 + $0x3a4] ss:$20 sps:$4 sm:$0xff]   ;;  %v3481_v46 = vld [vmem:[#allocation5 + $0x41c] ss:$20 sps:$4 sm:$0xff]  }
  0x5a   :  { %1894 = vmatprep.subr.bf16.mxu0 %v3372_v36  ;;  %2058 = vmatprep.subr.bf16.mxu1 %v3374_v37  ;;  %v3458_v35 = vld [vmem:[#allocation5 + $0x398] ss:$20 sps:$4 sm:$0xff]   ;;  %v3461_v36 = vld [vmem:[#allocation5 + $0x3a0] ss:$20 sps:$4 sm:$0xff]   ;;  %p3794_p13 = por %p3793_p12, %p3792_p11 }
  0x5b   :  { %v3466_v37 = vld [vmem:[#allocation5 + $0x3c4] ss:$20 sps:$4 sm:$0xff]  }
  0x5c   :  { %p3795_p0 = pnand %p3794_p13, %p3788_p10 }
  0x5d   :  { %1895 = vmatpush1.bf16.msra.mxu0 %v3376_v38  ;;  %2059 = vmatpush1.bf16.msra.mxu1 %v3377_v39  ;;  %v3469_v38 = vld [vmem:[#allocation5 + $0x3cc] ss:$20 sps:$4 sm:$0xff]  }
  0x5e   :  { %1896 = vmatprep.subr.bf16.mxu0 %v3378_v40  ;;  %2060 = vmatprep.subr.bf16.mxu1 %v3380_v41  ;;  %v3464_v39 = vld [vmem:[#allocation5 + $0x3c0] ss:$20 sps:$4 sm:$0xff]   ;;  %v3467_v40 = vld [vmem:[#allocation5 + $0x3c8] ss:$20 sps:$4 sm:$0xff]  }
  0x5f   :  { %v3472_v41 = vld [vmem:[#allocation5 + $0x3ec] ss:$20 sps:$4 sm:$0xff]  }
  0x61   :  { %1897 = vmatpush1.bf16.msra.mxu0 %v3382_v42  ;;  %2061 = vmatpush1.bf16.msra.mxu1 %v3383_v43  ;;  %v3475_v42 = vld [vmem:[#allocation5 + $0x3f4] ss:$20 sps:$4 sm:$0xff]  }
  0x62   :  { %1898 = vmatprep.subr.bf16.mxu0 %v3384_v44  ;;  %2062 = vmatprep.subr.bf16.mxu1 %v3386_v45  ;;  %v3470_v43 = vld [vmem:[#allocation5 + $0x3e8] ss:$20 sps:$4 sm:$0xff]   ;;  %v3473_v44 = vld [vmem:[#allocation5 + $0x3f0] ss:$20 sps:$4 sm:$0xff]  }
  0x63   :  { %v3478_v45 = vld [vmem:[#allocation5 + $0x414] ss:$20 sps:$4 sm:$0xff]  }
  0x65   :  { %1899 = vmatpush1.bf16.msra.mxu0 %v3388_v47  ;;  %2063 = vmatpush1.bf16.msra.mxu1 %v3389_v49  ;;  %v3476_v47 = vld [vmem:[#allocation5 + $0x410] ss:$20 sps:$4 sm:$0xff]   ;;  %v3479_v49 = vld [vmem:[#allocation5 + $0x418] ss:$20 sps:$4 sm:$0xff]  }
  0x66   :  { %1900 = vmatprep.subr.bf16.mxu0 %v3390_v50  ;;  %2064 = vmatprep.subr.bf16.mxu1 %v3392_v51  ;;  %v3484_v50 = vld [vmem:[#allocation5 + $0x43c] ss:$20 sps:$4 sm:$0xff]   ;;  %v3487_v51 = vld [vmem:[#allocation5 + $0x444] ss:$20 sps:$4 sm:$0xff]  }
  0x69   :  { %1901 = vmatpush1.bf16.msra.mxu0 %v3394_v52  ;;  %2065 = vmatpush1.bf16.msra.mxu1 %v3395_v53  ;;  %v3482_v52 = vld [vmem:[#allocation5 + $0x438] ss:$20 sps:$4 sm:$0xff]   ;;  %v3485_v53 = vld [vmem:[#allocation5 + $0x440] ss:$20 sps:$4 sm:$0xff]  }
  0x6a   :  { %1902 = vmatprep.subr.bf16.mxu0 %v3396_v54  ;;  %2066 = vmatprep.subr.bf16.mxu1 %v3398_v55  ;;  %v3490_v54 = vld [vmem:[#allocation5 + $0x464] ss:$20 sps:$4 sm:$0xff]   ;;  %v3493_v55 = vld [vmem:[#allocation5 + $0x46c] ss:$20 sps:$4 sm:$0xff]  }
  0x6d   :  { %1903 = vmatpush1.bf16.msra.mxu0 %v3400_v56  ;;  %2067 = vmatpush1.bf16.msra.mxu1 %v3401_v57  ;;  %v3488_v56 = vld [vmem:[#allocation5 + $0x460] ss:$20 sps:$4 sm:$0xff]   ;;  %v3491_v57 = vld [vmem:[#allocation5 + $0x468] ss:$20 sps:$4 sm:$0xff]  }
  0x6e   :  { %1904 = vmatprep.subr.bf16.mxu0 %v3402_v58  ;;  %2068 = vmatprep.subr.bf16.mxu1 %v3404_v59  ;;  %v3496_v58 = vld [vmem:[#allocation5 + $0x48c] ss:$20 sps:$4 sm:$0xff]   ;;  %v3499_v59 = vld [vmem:[#allocation5 + $0x494] ss:$20 sps:$4 sm:$0xff]  }
  0x71   :  { %1905 = vmatpush1.bf16.msra.mxu0 %v3406_v60  ;;  %2069 = vmatpush1.bf16.msra.mxu1 %v3407_v61  ;;  %v3494_v60 = vld [vmem:[#allocation5 + $0x488] ss:$20 sps:$4 sm:$0xff]   ;;  %v3497_v61 = vld [vmem:[#allocation5 + $0x490] ss:$20 sps:$4 sm:$0xff]  }
  0x72   :  { %1906 = vmatprep.subr.bf16.mxu0 %v3408_v62  ;;  %2070 = vmatprep.subr.bf16.mxu1 %v3410_v63  ;;  %v3502_v62 = vld [vmem:[#allocation5 + $0x4b4] ss:$20 sps:$4 sm:$0xff]   ;;  %v3505_v63 = vld [vmem:[#allocation5 + $0x4bc] ss:$20 sps:$4 sm:$0xff]  }
  0x75   :  { %1907 = vmatpush1.bf16.msra.mxu0 %v3412_v0  ;;  %2071 = vmatpush1.bf16.msra.mxu1 %v3413_v1  ;;  %v3500_v0 = vld [vmem:[#allocation5 + $0x4b0] ss:$20 sps:$4 sm:$0xff]   ;;  %v3503_v1 = vld [vmem:[#allocation5 + $0x4b8] ss:$20 sps:$4 sm:$0xff]  }
  0x76   :  { %1917 = vmatprep.subr.bf16.mxu0 %v3417_v2  ;;  %2081 = vmatprep.subr.bf16.mxu1 %v3420_v3  ;;  %v3508_v2 = vld [vmem:[#allocation5 + $0x4dc] ss:$20 sps:$4 sm:$0xff]   ;;  %v3511_v3 = vld [vmem:[#allocation5 + $0x4e4] ss:$20 sps:$4 sm:$0xff]  }
  0x78   :  { %1909 = vmatmul.mubr.bf16.vlgmr.msra.gmra.mrb[0].mxu0 %v3887_v5  ;;  %2073 = vmatmul.mubr.bf16.vlgmr.msra.gmra.mrb[0].mxu1 %v3887_v5 }
  0x79   :  { %1918 = vmatpush1.bf16.msra.mxu0 %v3415_v4  ;;  %2082 = vmatpush1.bf16.msra.mxu1 %v3418_v6  ;;  %v3506_v4 = vld [vmem:[#allocation5 + $0x4d8] ss:$20 sps:$4 sm:$0xff]   ;;  %v3509_v6 = vld [vmem:[#allocation5 + $0x4e0] ss:$20 sps:$4 sm:$0xff]  }
  0x7a   :  { %1919 = vmatprep.subr.bf16.mxu0 %v3424_v7  ;;  %2083 = vmatprep.subr.bf16.mxu1 %v3427_v8  ;;  %v3516_v7 = vld [vmem:[#allocation5 + $0x504] ss:$20 sps:$4 sm:$0xff]   ;;  %v3519_v8 = vld [vmem:[#allocation5 + $0x50c] ss:$20 sps:$4 sm:$0xff]  }
  0x7b   :  { %1949 = vmatprep.mubr.bf16.mxu0 %v3895_v30  ;;  %2113 = vmatprep.mubr.bf16.mxu1 %v3895_v30 }
  0x7d   :  { %1920 = vmatpush1.bf16.msra.mxu0 %v3422_v9  ;;  %2084 = vmatpush1.bf16.msra.mxu1 %v3425_v10  ;;  %v3901_v9 = vcombine.low %v3891_v29, %v3891_v29  ;;  %v3514_v10 = vld [vmem:[#allocation5 + $0x500] ss:$20 sps:$4 sm:$0xff]   ;;  %v3541_v29 = vld [vmem:[#allocation5 + $0x5a8] ss:$20 sps:$4 sm:$0xff]  }
  0x7e   :  { %1921 = vmatprep.subr.bf16.mxu0 %v3430_v11  ;;  %2085 = vmatprep.subr.bf16.mxu1 %v3433_v12  ;;  %v3517_v11 = vld [vmem:[#allocation5 + $0x508] ss:$20 sps:$4 sm:$0xff]   ;;  %v3522_v12 = vld [vmem:[#allocation5 + $0x52c] ss:$20 sps:$4 sm:$0xff]  }
  0x81   :  { %1922 = vmatpush1.bf16.msra.mxu0 %v3428_v13  ;;  %2086 = vmatpush1.bf16.msra.mxu1 %v3431_v14  ;;  %v3903_v13 = vld [vmem:[#allocation2 + $0x10] sm:$0xff] }
  0x82   :  { %1923 = vmatprep.subr.bf16.mxu0 %v3436_v15  ;;  %2087 = vmatprep.subr.bf16.mxu1 %v3439_v16  ;;  %v3525_v14 = vld [vmem:[#allocation5 + $0x534] ss:$20 sps:$4 sm:$0xff]   ;;  %v3907_v15 = vcombine.high %v3903_v13, %v3903_v13 }
  0x83   :  { %v3520_v16 = vld [vmem:[#allocation5 + $0x528] ss:$20 sps:$4 sm:$0xff]  }
  0x85   :  { %1924 = vmatpush1.bf16.msra.mxu0 %v3434_v17  ;;  %2088 = vmatpush1.bf16.msra.mxu1 %v3437_v18  ;;  %v3523_v17 = vld [vmem:[#allocation5 + $0x530] ss:$20 sps:$4 sm:$0xff]   ;;  %v3528_v18 = vld [vmem:[#allocation5 + $0x554] ss:$20 sps:$4 sm:$0xff]  }
  0x86   :  { %1925 = vmatprep.subr.bf16.mxu0 %v3442_v19  ;;  %2089 = vmatprep.subr.bf16.mxu1 %v3445_v20  ;;  %v3531_v19 = vld [vmem:[#allocation5 + $0x55c] ss:$20 sps:$4 sm:$0xff]  }
  0x87   :  { %v3526_v20 = vld [vmem:[#allocation5 + $0x550] ss:$20 sps:$4 sm:$0xff]  }
  0x89   :  { %1926 = vmatpush1.bf16.msra.mxu0 %v3440_v21  ;;  %2090 = vmatpush1.bf16.msra.mxu1 %v3443_v22  ;;  %v3529_v21 = vld [vmem:[#allocation5 + $0x558] ss:$20 sps:$4 sm:$0xff]   ;;  %v3534_v22 = vld [vmem:[#allocation5 + $0x57c] ss:$20 sps:$4 sm:$0xff]  }
  0x8a   :  { %1927 = vmatprep.subr.bf16.mxu0 %v3448_v23  ;;  %2091 = vmatprep.subr.bf16.mxu1 %v3451_v24  ;;  %v3537_v23 = vld [vmem:[#allocation5 + $0x584] ss:$20 sps:$4 sm:$0xff]  }
  0x8b   :  { %v3532_v24 = vld [vmem:[#allocation5 + $0x578] ss:$20 sps:$4 sm:$0xff]  }
  0x8d   :  { %1928 = vmatpush1.bf16.msra.mxu0 %v3446_v25  ;;  %2092 = vmatpush1.bf16.msra.mxu1 %v3449_v26  ;;  %v3535_v25 = vld [vmem:[#allocation5 + $0x580] ss:$20 sps:$4 sm:$0xff]   ;;  %v3540_v26 = vld [vmem:[#allocation5 + $0x5a4] ss:$20 sps:$4 sm:$0xff]  }
  0x8e   :  { %1929 = vmatprep.subr.bf16.mxu0 %v3454_v27  ;;  %2093 = vmatprep.subr.bf16.mxu1 %v3457_v28  ;;  %v3543_v27 = vld [vmem:[#allocation5 + $0x5ac] ss:$20 sps:$4 sm:$0xff]  }
  0x8f   :  { %v3538_v28 = vld [vmem:[#allocation5 + $0x5a0] ss:$20 sps:$4 sm:$0xff]  }
  0x91   :  { %1930 = vmatpush1.bf16.msra.mxu0 %v3452_v31  ;;  %2094 = vmatpush1.bf16.msra.mxu1 %v3455_v32  ;;  %v3546_v31 = vld [vmem:[#allocation5 + $0x5cc] ss:$20 sps:$4 sm:$0xff]   ;;  %v3549_v32 = vld [vmem:[#allocation5 + $0x5d4] ss:$20 sps:$4 sm:$0xff]  }
  0x92   :  { %1931 = vmatprep.subr.bf16.mxu0 %v3460_v33  ;;  %2095 = vmatprep.subr.bf16.mxu1 %v3463_v34  ;;  %v3544_v33 = vld [vmem:[#allocation5 + $0x5c8] ss:$20 sps:$4 sm:$0xff]   ;;  %v3547_v34 = vld [vmem:[#allocation5 + $0x5d0] ss:$20 sps:$4 sm:$0xff]  }
  0x95   :  { %1932 = vmatpush1.bf16.msra.mxu0 %v3458_v35  ;;  %2096 = vmatpush1.bf16.msra.mxu1 %v3461_v36  ;;  %v3552_v35 = vld [vmem:[#allocation5 + $0x5f4] ss:$20 sps:$4 sm:$0xff]   ;;  %v3555_v36 = vld [vmem:[#allocation5 + $0x5fc] ss:$20 sps:$4 sm:$0xff]  }
  0x96   :  { %1933 = vmatprep.subr.bf16.mxu0 %v3466_v37  ;;  %2097 = vmatprep.subr.bf16.mxu1 %v3469_v38  ;;  %v3550_v37 = vld [vmem:[#allocation5 + $0x5f0] ss:$20 sps:$4 sm:$0xff]   ;;  %v3553_v38 = vld [vmem:[#allocation5 + $0x5f8] ss:$20 sps:$4 sm:$0xff]  }
  0x99   :  { %1934 = vmatpush1.bf16.msra.mxu0 %v3464_v39  ;;  %2098 = vmatpush1.bf16.msra.mxu1 %v3467_v40  ;;  %v3558_v39 = vld [vmem:[#allocation5 + $0x61c] ss:$20 sps:$4 sm:$0xff]   ;;  %v3561_v40 = vld [vmem:[#allocation5 + $0x624] ss:$20 sps:$4 sm:$0xff]  }
  0x9a   :  { %1935 = vmatprep.subr.bf16.mxu0 %v3472_v41  ;;  %2099 = vmatprep.subr.bf16.mxu1 %v3475_v42  ;;  %v3556_v41 = vld [vmem:[#allocation5 + $0x618] ss:$20 sps:$4 sm:$0xff]   ;;  %v3559_v42 = vld [vmem:[#allocation5 + $0x620] ss:$20 sps:$4 sm:$0xff]  }
  0x9d   :  { %1936 = vmatpush1.bf16.msra.mxu0 %v3470_v43  ;;  %2100 = vmatpush1.bf16.msra.mxu1 %v3473_v44  ;;  %v3564_v43 = vld [vmem:[#allocation5 + $0x644] ss:$20 sps:$4 sm:$0xff]   ;;  %v3567_v44 = vld [vmem:[#allocation5 + $0x64c] ss:$20 sps:$4 sm:$0xff]  }
  0x9e   :  { %1937 = vmatprep.subr.bf16.mxu0 %v3478_v45  ;;  %2101 = vmatprep.subr.bf16.mxu1 %v3481_v46  ;;  %v3562_v45 = vld [vmem:[#allocation5 + $0x640] ss:$20 sps:$4 sm:$0xff]   ;;  %v3565_v46 = vld [vmem:[#allocation5 + $0x648] ss:$20 sps:$4 sm:$0xff]  }
  0xa1   :  { %1938 = vmatpush1.bf16.msra.mxu0 %v3476_v47  ;;  %2102 = vmatpush1.bf16.msra.mxu1 %v3479_v49  ;;  %v3570_v47 = vld [vmem:[#allocation5 + $0x66c] ss:$20 sps:$4 sm:$0xff]   ;;  %v3573_v49 = vld [vmem:[#allocation5 + $0x674] ss:$20 sps:$4 sm:$0xff]  }
  0xa2   :  { %1939 = vmatprep.subr.bf16.mxu0 %v3484_v50  ;;  %2103 = vmatprep.subr.bf16.mxu1 %v3487_v51  ;;  %v3568_v50 = vld [vmem:[#allocation5 + $0x668] ss:$20 sps:$4 sm:$0xff]   ;;  %v3571_v51 = vld [vmem:[#allocation5 + $0x670] ss:$20 sps:$4 sm:$0xff]  }
  0xa5   :  { %1940 = vmatpush1.bf16.msra.mxu0 %v3482_v52  ;;  %2104 = vmatpush1.bf16.msra.mxu1 %v3485_v53  ;;  %v3576_v52 = vld [vmem:[#allocation5 + $0x694] ss:$20 sps:$4 sm:$0xff]   ;;  %v3579_v53 = vld [vmem:[#allocation5 + $0x69c] ss:$20 sps:$4 sm:$0xff]  }
  0xa6   :  { %1941 = vmatprep.subr.bf16.mxu0 %v3490_v54  ;;  %2105 = vmatprep.subr.bf16.mxu1 %v3493_v55  ;;  %v3574_v54 = vld [vmem:[#allocation5 + $0x690] ss:$20 sps:$4 sm:$0xff]   ;;  %v3577_v55 = vld [vmem:[#allocation5 + $0x698] ss:$20 sps:$4 sm:$0xff]  }
  0xa9   :  { %1942 = vmatpush1.bf16.msra.mxu0 %v3488_v56  ;;  %2106 = vmatpush1.bf16.msra.mxu1 %v3491_v57  ;;  %v3582_v56 = vld [vmem:[#allocation5 + $0x6bc] ss:$20 sps:$4 sm:$0xff]   ;;  %v3585_v57 = vld [vmem:[#allocation5 + $0x6c4] ss:$20 sps:$4 sm:$0xff]  }
  0xaa   :  { %1943 = vmatprep.subr.bf16.mxu0 %v3496_v58  ;;  %2107 = vmatprep.subr.bf16.mxu1 %v3499_v59  ;;  %v3580_v58 = vld [vmem:[#allocation5 + $0x6b8] ss:$20 sps:$4 sm:$0xff]   ;;  %v3583_v59 = vld [vmem:[#allocation5 + $0x6c0] ss:$20 sps:$4 sm:$0xff]  }
  0xad   :  { %1944 = vmatpush1.bf16.msra.mxu0 %v3494_v60  ;;  %2108 = vmatpush1.bf16.msra.mxu1 %v3497_v61  ;;  %v3588_v60 = vld [vmem:[#allocation5 + $0x6e4] ss:$20 sps:$4 sm:$0xff]   ;;  %v3591_v61 = vld [vmem:[#allocation5 + $0x6ec] ss:$20 sps:$4 sm:$0xff]  }
  0xae   :  { %1945 = vmatprep.subr.bf16.mxu0 %v3502_v62  ;;  %2109 = vmatprep.subr.bf16.mxu1 %v3505_v63  ;;  %v3586_v62 = vld [vmem:[#allocation5 + $0x6e0] ss:$20 sps:$4 sm:$0xff]   ;;  %v3589_v63 = vld [vmem:[#allocation5 + $0x6e8] ss:$20 sps:$4 sm:$0xff]  }
  0xb1   :  { %1946 = vmatpush1.bf16.msra.mxu0 %v3500_v0  ;;  %2110 = vmatpush1.bf16.msra.mxu1 %v3503_v1  ;;  %v3594_v0 = vld [vmem:[#allocation5 + $0x70c] ss:$20 sps:$4 sm:$0xff]   ;;  %v3597_v1 = vld [vmem:[#allocation5 + $0x714] ss:$20 sps:$4 sm:$0xff]  }
  0xb2   :  { %1947 = vmatprep.subr.bf16.mxu0 %v3508_v2  ;;  %2111 = vmatprep.subr.bf16.mxu1 %v3511_v3  ;;  %v3592_v2 = vld [vmem:[#allocation5 + $0x708] ss:$20 sps:$4 sm:$0xff]   ;;  %v3595_v3 = vld [vmem:[#allocation5 + $0x710] ss:$20 sps:$4 sm:$0xff]  }
  0xb5   :  { %1948 = vmatpush1.bf16.msra.mxu0 %v3506_v4  ;;  %2112 = vmatpush1.bf16.msra.mxu1 %v3509_v6  ;;  %v3600_v4 = vld [vmem:[#allocation5 + $0x734] ss:$20 sps:$4 sm:$0xff]   ;;  %v3603_v6 = vld [vmem:[#allocation5 + $0x73c] ss:$20 sps:$4 sm:$0xff]  }
  0xb6   :  { %1958 = vmatprep.subr.bf16.mxu0 %v3516_v7  ;;  %2122 = vmatprep.subr.bf16.mxu1 %v3519_v8  ;;  %v3598_v7 = vld [vmem:[#allocation5 + $0x730] ss:$20 sps:$4 sm:$0xff]   ;;  %v3601_v8 = vld [vmem:[#allocation5 + $0x738] ss:$20 sps:$4 sm:$0xff]  }
  0xb8   :  { %1950 = vmatmul.mubr.bf16.vlgmr.msra.gmra.mrb[0].mxu0 %v3901_v9  ;;  %2114 = vmatmul.mubr.bf16.vlgmr.msra.gmra.mrb[0].mxu1 %v3901_v9 }
  0xb9   :  { %1959 = vmatpush1.bf16.msra.mxu0 %v3514_v10  ;;  %2123 = vmatpush1.bf16.msra.mxu1 %v3517_v11  ;;  %v3606_v10 = vld [vmem:[#allocation5 + $0x75c] ss:$20 sps:$4 sm:$0xff]   ;;  %v3609_v11 = vld [vmem:[#allocation5 + $0x764] ss:$20 sps:$4 sm:$0xff]  }
  0xba   :  { %1960 = vmatprep.subr.bf16.mxu0 %v3522_v12  ;;  %2124 = vmatprep.subr.bf16.mxu1 %v3525_v14  ;;  %v3604_v12 = vld [vmem:[#allocation5 + $0x758] ss:$20 sps:$4 sm:$0xff]   ;;  %v3607_v14 = vld [vmem:[#allocation5 + $0x760] ss:$20 sps:$4 sm:$0xff]  }
  0xbb   :  { %1990 = vmatprep.mubr.bf16.mxu0 %v3907_v15  ;;  %2154 = vmatprep.mubr.bf16.mxu1 %v3907_v15 }
  0xbd   :  { %1961 = vmatpush1.bf16.msra.mxu0 %v3520_v16  ;;  %2125 = vmatpush1.bf16.msra.mxu1 %v3523_v17  ;;  %v3614_v16 = vld [vmem:[#allocation5 + $0x784] ss:$20 sps:$4 sm:$0xff]   ;;  %v3617_v17 = vld [vmem:[#allocation5 + $0x78c] ss:$20 sps:$4 sm:$0xff]  }
  0xbe   :  { %1962 = vmatprep.subr.bf16.mxu0 %v3528_v18  ;;  %2126 = vmatprep.subr.bf16.mxu1 %v3531_v19  ;;  %v3612_v18 = vld [vmem:[#allocation5 + $0x780] ss:$20 sps:$4 sm:$0xff]   ;;  %v3915_v19 = vcombine.low %v3903_v13, %v3903_v13  ;;  %v3629_v13 = vld [vmem:[#allocation5 + $0x7dc] ss:$20 sps:$4 sm:$0xff]  }
  0xc1   :  { %1963 = vmatpush1.bf16.msra.mxu0 %v3526_v20  ;;  %2127 = vmatpush1.bf16.msra.mxu1 %v3529_v21  ;;  %v3615_v20 = vld [vmem:[#allocation5 + $0x788] ss:$20 sps:$4 sm:$0xff]   ;;  %v3620_v21 = vld [vmem:[#allocation5 + $0x7ac] ss:$20 sps:$4 sm:$0xff]  }
  0xc2   :  { %1964 = vmatprep.subr.bf16.mxu0 %v3534_v22  ;;  %2128 = vmatprep.subr.bf16.mxu1 %v3537_v23  ;;  %v3623_v22 = vld [vmem:[#allocation5 + $0x7b4] ss:$20 sps:$4 sm:$0xff]  }
  0xc3   :  { %v3618_v23 = vld [vmem:[#allocation5 + $0x7a8] ss:$20 sps:$4 sm:$0xff]  }
  0xc5   :  { %1965 = vmatpush1.bf16.msra.mxu0 %v3532_v24  ;;  %2129 = vmatpush1.bf16.msra.mxu1 %v3535_v25  ;;  %v3621_v24 = vld [vmem:[#allocation5 + $0x7b0] ss:$20 sps:$4 sm:$0xff]   ;;  %v3626_v25 = vld [vmem:[#allocation5 + $0x7d4] ss:$20 sps:$4 sm:$0xff]  }
  0xc6   :  { %1966 = vmatprep.subr.bf16.mxu0 %v3540_v26  ;;  %2130 = vmatprep.subr.bf16.mxu1 %v3543_v27  ;;  %v3624_v26 = vld [vmem:[#allocation5 + $0x7d0] ss:$20 sps:$4 sm:$0xff]   ;;  %v3822_v27 = vmov 0  }
  0xc9   :  { %1967 = vmatpush1.bf16.msra.mxu0 %v3538_v28  ;;  %2131 = vmatpush1.bf16.msra.mxu1 %v3541_v29  ;;  %v3627_v28 = vld [vmem:[#allocation5 + $0x7d8] ss:$20 sps:$4 sm:$0xff]   ;;  %v3632_v29 = vld [vmem:[#allocation5 + $0x7fc] ss:$20 sps:$4 sm:$0xff]  }
  0xca   :  { %1968 = vmatprep.subr.bf16.mxu0 %v3546_v31  ;;  %2132 = vmatprep.subr.bf16.mxu1 %v3549_v32  ;;  %v3635_v31 = vld [vmem:[#allocation5 + $0x804] ss:$20 sps:$4 sm:$0xff]  }
  0xcb   :  { %v3630_v32 = vld [vmem:[#allocation5 + $0x7f8] ss:$20 sps:$4 sm:$0xff]  }
  0xcd   :  { %1969 = vmatpush1.bf16.msra.mxu0 %v3544_v33  ;;  %2133 = vmatpush1.bf16.msra.mxu1 %v3547_v34  ;;  %v3633_v33 = vld [vmem:[#allocation5 + $0x800] ss:$20 sps:$4 sm:$0xff]   ;;  %v3638_v34 = vld [vmem:[#allocation5 + $0x824] ss:$20 sps:$4 sm:$0xff]  }
  0xce   :  { %1970 = vmatprep.subr.bf16.mxu0 %v3552_v35  ;;  %2134 = vmatprep.subr.bf16.mxu1 %v3555_v36  ;;  %v3641_v35 = vld [vmem:[#allocation5 + $0x82c] ss:$20 sps:$4 sm:$0xff]  }
  0xcf   :  { %v3636_v36 = vld [vmem:[#allocation5 + $0x820] ss:$20 sps:$4 sm:$0xff]  }
  0xd1   :  { %1971 = vmatpush1.bf16.msra.mxu0 %v3550_v37  ;;  %2135 = vmatpush1.bf16.msra.mxu1 %v3553_v38  ;;  %v3639_v37 = vld [vmem:[#allocation5 + $0x828] ss:$20 sps:$4 sm:$0xff]   ;;  %v3644_v38 = vld [vmem:[#allocation5 + $0x84c] ss:$20 sps:$4 sm:$0xff]  }
  0xd2   :  { %1972 = vmatprep.subr.bf16.mxu0 %v3558_v39  ;;  %2136 = vmatprep.subr.bf16.mxu1 %v3561_v40  ;;  %v3647_v39 = vld [vmem:[#allocation5 + $0x854] ss:$20 sps:$4 sm:$0xff]  }
  0xd3   :  { %v3642_v40 = vld [vmem:[#allocation5 + $0x848] ss:$20 sps:$4 sm:$0xff]  }
  0xd5   :  { %1973 = vmatpush1.bf16.msra.mxu0 %v3556_v41  ;;  %2137 = vmatpush1.bf16.msra.mxu1 %v3559_v42  ;;  %v3645_v41 = vld [vmem:[#allocation5 + $0x850] ss:$20 sps:$4 sm:$0xff]   ;;  %v3650_v42 = vld [vmem:[#allocation5 + $0x874] ss:$20 sps:$4 sm:$0xff]  }
  0xd6   :  { %1974 = vmatprep.subr.bf16.mxu0 %v3564_v43  ;;  %2138 = vmatprep.subr.bf16.mxu1 %v3567_v44  ;;  %v3653_v43 = vld [vmem:[#allocation5 + $0x87c] ss:$20 sps:$4 sm:$0xff]  }
  0xd7   :  { %v3648_v44 = vld [vmem:[#allocation5 + $0x870] ss:$20 sps:$4 sm:$0xff]  }
  0xd9   :  { %1975 = vmatpush1.bf16.msra.mxu0 %v3562_v45  ;;  %2139 = vmatpush1.bf16.msra.mxu1 %v3565_v46  ;;  %v3651_v45 = vld [vmem:[#allocation5 + $0x878] ss:$20 sps:$4 sm:$0xff]   ;;  %v3656_v46 = vld [vmem:[#allocation5 + $0x89c] ss:$20 sps:$4 sm:$0xff]  }
  0xda   :  { %1976 = vmatprep.subr.bf16.mxu0 %v3570_v47  ;;  %2140 = vmatprep.subr.bf16.mxu1 %v3573_v49  ;;  %v3659_v47 = vld [vmem:[#allocation5 + $0x8a4] ss:$20 sps:$4 sm:$0xff]  }
  0xdb   :  { %v3654_v49 = vld [vmem:[#allocation5 + $0x898] ss:$20 sps:$4 sm:$0xff]  }
  0xdd   :  { %1977 = vmatpush1.bf16.msra.mxu0 %v3568_v50  ;;  %2141 = vmatpush1.bf16.msra.mxu1 %v3571_v51  ;;  %v3657_v50 = vld [vmem:[#allocation5 + $0x8a0] ss:$20 sps:$4 sm:$0xff]   ;;  %v3661_v51 = vld [vmem:[#allocation5 + $0x150] ss:$20 sps:$4 sm:$0xff]  }
  0xde   :  { %1978 = vmatprep.subr.bf16.mxu0 %v3576_v52  ;;  %2142 = vmatprep.subr.bf16.mxu1 %v3579_v53  ;;  %v3662_v52 = vld [vmem:[#allocation5 + $0x3d0] ss:$20 sps:$4 sm:$0xff]   ;;  %v3919_v53 = vld [vmem:[#allocation2 + $0x18] ss:$0 sps:$4 sm:$0xff]  }
  0xe1   :  { %1979 = vmatpush1.bf16.msra.mxu0 %v3574_v54  ;;  %2143 = vmatpush1.bf16.msra.mxu1 %v3577_v55  ;;  %v3663_v54 = vld [vmem:[#allocation5 + $0x10] ss:$20 sps:$4 sm:$0xff]  }
  0xe2   :  { %1980 = vmatprep.subr.bf16.mxu0 %v3582_v56  ;;  %2144 = vmatprep.subr.bf16.mxu1 %v3585_v57  ;;  %v3664_v55 = vld [vmem:[#allocation5 + $0x290] ss:$20 sps:$4 sm:$0xff]   ;;  %v3665_v56 = vld [vmem:[#allocation5 + $0x178] ss:$20 sps:$4 sm:$0xff]  }
  0xe3   :  { %v3666_v57 = vld [vmem:[#allocation5 + $0x3f8] ss:$20 sps:$4 sm:$0xff]  }
  0xe5   :  { %1981 = vmatpush1.bf16.msra.mxu0 %v3580_v58  ;;  %2145 = vmatpush1.bf16.msra.mxu1 %v3583_v59  ;;  %v3667_v58 = vld [vmem:[#allocation5 + $0x38] ss:$20 sps:$4 sm:$0xff]  }
  0xe6   :  { %1982 = vmatprep.subr.bf16.mxu0 %v3588_v60  ;;  %2146 = vmatprep.subr.bf16.mxu1 %v3591_v61  ;;  %v3668_v59 = vld [vmem:[#allocation5 + $0x2b8] ss:$20 sps:$4 sm:$0xff]   ;;  %v3669_v60 = vld [vmem:[#allocation5 + $0x1a0] ss:$20 sps:$4 sm:$0xff]  }
  0xe7   :  { %v3670_v61 = vld [vmem:[#allocation5 + $0x420] ss:$20 sps:$4 sm:$0xff]  }
  0xe9   :  { %1983 = vmatpush1.bf16.msra.mxu0 %v3586_v62  ;;  %2147 = vmatpush1.bf16.msra.mxu1 %v3589_v63  ;;  %v3671_v62 = vld [vmem:[#allocation5 + $0x60] ss:$20 sps:$4 sm:$0xff]  }
  0xea   :  { %1984 = vmatprep.subr.bf16.mxu0 %v3594_v0  ;;  %2148 = vmatprep.subr.bf16.mxu1 %v3597_v1  ;;  %v3672_v63 = vld [vmem:[#allocation5 + $0x2e0] ss:$20 sps:$4 sm:$0xff]   ;;  %v3673_v0 = vld [vmem:[#allocation5 + $0x1c8] ss:$20 sps:$4 sm:$0xff]  }
  0xeb   :  { %v3674_v1 = vld [vmem:[#allocation5 + $0x448] ss:$20 sps:$4 sm:$0xff]  }
  0xed   :  { %1985 = vmatpush1.bf16.msra.mxu0 %v3592_v2  ;;  %2149 = vmatpush1.bf16.msra.mxu1 %v3595_v3  ;;  %v3675_v2 = vld [vmem:[#allocation5 + $0x88] ss:$20 sps:$4 sm:$0xff]  }
  0xee   :  { %1986 = vmatprep.subr.bf16.mxu0 %v3600_v4  ;;  %2150 = vmatprep.subr.bf16.mxu1 %v3603_v6  ;;  %v3676_v3 = vld [vmem:[#allocation5 + $0x308] ss:$20 sps:$4 sm:$0xff]   ;;  %v3677_v4 = vld [vmem:[#allocation5 + $0x1f0] ss:$20 sps:$4 sm:$0xff]  }
  0xef   :  { %v3678_v6 = vld [vmem:[#allocation5 + $0x470] ss:$20 sps:$4 sm:$0xff]  }
  0xf1   :  { %1987 = vmatpush1.bf16.msra.mxu0 %v3598_v7  ;;  %2151 = vmatpush1.bf16.msra.mxu1 %v3601_v8  ;;  %v3681_v7 = vld [vmem:[#allocation5 + $0x218] ss:$20 sps:$4 sm:$0xff]  }
  0xf2   :  { %1988 = vmatprep.subr.bf16.mxu0 %v3606_v10  ;;  %2152 = vmatprep.subr.bf16.mxu1 %v3609_v11  ;;  %v3682_v8 = vld [vmem:[#allocation5 + $0x498] ss:$20 sps:$4 sm:$0xff]  }
  0xf3   :  { %v3683_v10 = vld [vmem:[#allocation5 + $0xd8] ss:$20 sps:$4 sm:$0xff]  }
  0xf4   :  { %v3684_v11 = vld [vmem:[#allocation5 + $0x358] ss:$20 sps:$4 sm:$0xff]  }
  0xf5   :  { %1989 = vmatpush1.bf16.msra.mxu0 %v3604_v12  ;;  %2153 = vmatpush1.bf16.msra.mxu1 %v3607_v14  ;;  %v3685_v12 = vld [vmem:[#allocation5 + $0x240] ss:$20 sps:$4 sm:$0xff]  }
  0xf6   :  { %1999 = vmatprep.subr.bf16.mxu0 %v3614_v16  ;;  %2163 = vmatprep.subr.bf16.mxu1 %v3617_v17  ;;  %v3686_v14 = vld [vmem:[#allocation5 + $0x4c0] ss:$20 sps:$4 sm:$0xff]  }
  0xf7   :  { %v3687_v16 = vld [vmem:[#allocation5 + $0x100] ss:$20 sps:$4 sm:$0xff]  }
  0xf8   :  { %1991 = vmatmul.mubr.bf16.vlgmr.msra.gmra.mrb[0].mxu0 %v3915_v19  ;;  %2155 = vmatmul.mubr.bf16.vlgmr.msra.gmra.mrb[0].mxu1 %v3915_v19  ;;  %v3688_v17 = vld [vmem:[#allocation5 + $0x380] ss:$20 sps:$4 sm:$0xff]  }
  0xf9   :  { %2000 = vmatpush1.bf16.msra.mxu0 %v3612_v18  ;;  %2164 = vmatpush1.bf16.msra.mxu1 %v3615_v20  ;;  %v3689_v18 = vld [vmem:[#allocation5 + $0x268] ss:$20 sps:$4 sm:$0xff]  }
  0xfa   :  { %2001 = vmatprep.subr.bf16.mxu0 %v3620_v21  ;;  %2165 = vmatprep.subr.bf16.mxu1 %v3623_v22  ;;  %v3690_v20 = vld [vmem:[#allocation5 + $0x4e8] ss:$20 sps:$4 sm:$0xff]  }
  0xfb   :  { %2031 = vmatprep.mubr.bf16.mxu0 %v3822_v27  ;;  %2195 = vmatprep.mubr.bf16.mxu1 %v3822_v27  ;;  %v3691_v21 = vld [vmem:[#allocation5 + $0x128] ss:$20 sps:$4 sm:$0xff]   ;;  %v3697_v27 = vld [vmem:[#allocation5 + $0x538] ss:$20 sps:$4 sm:$0xff]  }
  0xfc   :  { %v3692_v22 = vld [vmem:[#allocation5 + $0x3a8] ss:$20 sps:$4 sm:$0xff]  }
  0xfd   :  { %2002 = vmatpush1.bf16.msra.mxu0 %v3618_v23  ;;  %2166 = vmatpush1.bf16.msra.mxu1 %v3621_v24  ;;  %v3693_v23 = vld [vmem:[#allocation5 + $0x650] ss:$20 sps:$4 sm:$0xff]  }
  0xfe   :  { %2003 = vmatprep.subr.bf16.mxu0 %v3626_v25  ;;  %2167 = vmatprep.subr.bf16.mxu1 %v3629_v13  ;;  %v3694_v24 = vld [vmem:[#allocation5 + $0x510] ss:$20 sps:$4 sm:$0xff]   ;;  %v3823_v13 = vmov 0.0  }
  0xff   :  { %v3695_v25 = vld [vmem:[#allocation5 + $0x790] ss:$20 sps:$4 sm:$0xff]  }
 0x101   :  { %2004 = vmatpush1.bf16.msra.mxu0 %v3624_v26  ;;  %2168 = vmatpush1.bf16.msra.mxu1 %v3627_v28  ;;  %v3696_v26 = vld [vmem:[#allocation5 + $0x678] ss:$20 sps:$4 sm:$0xff]  }
 0x102   :  { %2005 = vmatprep.subr.bf16.mxu0 %v3632_v29  ;;  %2169 = vmatprep.subr.bf16.mxu1 %v3635_v31  ;;  %v3698_v28 = vld [vmem:[#allocation5 + $0x7b8] ss:$20 sps:$4 sm:$0xff]   ;;  %v3699_v29 = vld [vmem:[#allocation5 + $0x6a0] ss:$20 sps:$4 sm:$0xff]  }
 0x103   :  { %v3700_v31 = vld [vmem:[#allocation5 + $0x560] ss:$20 sps:$4 sm:$0xff]  }
 0x105   :  { %2006 = vmatpush1.bf16.msra.mxu0 %v3630_v32  ;;  %2170 = vmatpush1.bf16.msra.mxu1 %v3633_v33  ;;  %v3703_v32 = vld [vmem:[#allocation5 + $0x588] ss:$20 sps:$4 sm:$0xff]  }
 0x106   :  { %2007 = vmatprep.subr.bf16.mxu0 %v3638_v34  ;;  %2171 = vmatprep.subr.bf16.mxu1 %v3641_v35  ;;  %v3704_v33 = vld [vmem:[#allocation5 + $0x808] ss:$20 sps:$4 sm:$0xff]   ;;  %v3706_v34 = vld [vmem:[#allocation5 + $0x5b0] ss:$20 sps:$4 sm:$0xff]  }
 0x107   :  { %v3707_v35 = vld [vmem:[#allocation5 + $0x830] ss:$20 sps:$4 sm:$0xff]  }
 0x109   :  { %2008 = vmatpush1.bf16.msra.mxu0 %v3636_v36  ;;  %2172 = vmatpush1.bf16.msra.mxu1 %v3639_v37  ;;  %v3708_v36 = vld [vmem:[#allocation5 + $0x718] ss:$20 sps:$4 sm:$0xff]  }
 0x10a   :  { %2009 = vmatprep.subr.bf16.mxu0 %v3644_v38  ;;  %2173 = vmatprep.subr.bf16.mxu1 %v3647_v39  ;;  %v3709_v37 = vld [vmem:[#allocation5 + $0x5d8] ss:$20 sps:$4 sm:$0xff]   ;;  %v3711_v39 = vld [vmem:[#allocation5 + $0x740] ss:$20 sps:$4 sm:$0xff]  }
 0x10b   :  { %v3710_v38 = vld [vmem:[#allocation5 + $0x858] ss:$20 sps:$4 sm:$0xff]  }
 0x10d   :  { %2010 = vmatpush1.bf16.msra.mxu0 %v3642_v40  ;;  %2174 = vmatpush1.bf16.msra.mxu1 %v3645_v41  ;;  %v3712_v40 = vld [vmem:[#allocation5 + $0x600] ss:$20 sps:$4 sm:$0xff]  }
 0x10e   :  { %2011 = vmatprep.subr.bf16.mxu0 %v3650_v42  ;;  %2175 = vmatprep.subr.bf16.mxu1 %v3653_v43  ;;  %v3713_v41 = vld [vmem:[#allocation5 + $0x880] ss:$20 sps:$4 sm:$0xff]   ;;  %v3714_v42 = vld [vmem:[#allocation5 + $0x768] ss:$20 sps:$4 sm:$0xff]  }
 0x10f   :  { %v2385_v43 = vld [vmem:[#allocation7 + $0x80] sm:$0xff] }
 0x111   :  { %2012 = vmatpush1.bf16.msra.mxu0 %v3648_v44  ;;  %2176 = vmatpush1.bf16.msra.mxu1 %v3651_v45  ;;  %v2386_v44 = vld [vmem:[#allocation7 + $0x88] sm:$0xff]  ;;  %v2417_v45 = vld [vmem:[#allocation7 + $0x180] sm:$0xff] }
 0x112   :  { %2013 = vmatprep.subr.bf16.mxu0 %v3656_v46  ;;  %2177 = vmatprep.subr.bf16.mxu1 %v3659_v47  ;;  %v2418_v46 = vld [vmem:[#allocation7 + $0x188] sm:$0xff] }
 0x113   :  { %v3715_v47 = vld [vmem:[#allocation5 + $0x628] ss:$20 sps:$4 sm:$0xff]  }
 0x115   :  { %2014 = vmatpush1.bf16.msra.mxu0 %v3654_v49  ;;  %2178 = vmatpush1.bf16.msra.mxu1 %v3657_v50  ;;  %v3716_v49 = vld [vmem:[#allocation5 + $0x8a8] ss:$20 sps:$4 sm:$0xff]   ;;  %v2369_v50 = vld [vmem:[#allocation7] sm:$0xff] }
 0x116   :  { %2977 = vmatprep.subr.bf16.mxu0 %v3661_v51  ;;  %2999 = vmatprep.subr.bf16.mxu1 %v3662_v52  ;;  %v2370_v51 = vld [vmem:[#allocation7 + $0x8] sm:$0xff]  ;;  %v3194_v52 = vpack.c.bf16 %v2386_v44, %v2385_v43  ;;  %v2428_v43 = vld [vmem:[#allocation7 + $0x1d8] sm:$0xff] }
 0x118   :  { %2032 = vmatmul.mubr.bf16.vlgmr.msra.gmra.mrb[0].mxu0 %v3919_v53  ;;  %2196 = vmatmul.mubr.bf16.vlgmr.msra.gmra.mrb[0].mxu1 %v3919_v53 }
 0x119   :  { %2978 = vmatpush3.bf16.msra.mxu0 %v3663_v54  ;;  %3000 = vmatpush3.bf16.msra.mxu1 %v3664_v55  ;;  %v3226_v54 = vpack.c.bf16 %v2418_v46, %v2417_v45  ;;  %v2401_v55 = vld [vmem:[#allocation7 + $0x100] sm:$0xff]  ;;  %v2379_v46 = vld [vmem:[#allocation7 + $0x50] sm:$0xff] }
 0x11a   :  { %2979 = vmatprep.subr.bf16.mxu0 %v3665_v56  ;;  %3001 = vmatprep.subr.bf16.mxu1 %v3666_v57  ;;  %v2402_v56 = vld [vmem:[#allocation7 + $0x108] sm:$0xff]  ;;  %v2387_v57 = vld [vmem:[#allocation7 + $0x90] sm:$0xff] }
 0x11b   :  { %2236 = vmatprep.mubr.bf16.mxu0 %v3883_v48  ;;  %2276 = vmatprep.mubr.bf16.mxu1 %v3895_v30  ;;  %v3679_v48 = vld [vmem:[#allocation5 + $0xb0] ss:$20 sps:$4 sm:$0xff]  }
 0x11c   :  { %v3680_v30 = vld [vmem:[#allocation5 + $0x330] ss:$20 sps:$4 sm:$0xff]  }
 0x11d   :  { %2980 = vmatpush3.bf16.msra.mxu0 %v3667_v58  ;;  %3002 = vmatpush3.bf16.msra.mxu1 %v3668_v59  ;;  %v2388_v58 = vld [vmem:[#allocation7 + $0x98] sm:$0xff]  ;;  %v2419_v59 = vld [vmem:[#allocation7 + $0x190] sm:$0xff] }
 0x11e   :  { %2981 = vmatprep.subr.bf16.mxu0 %v3669_v60  ;;  %3003 = vmatprep.subr.bf16.mxu1 %v3670_v61  ;;  %v2420_v60 = vld [vmem:[#allocation7 + $0x198] sm:$0xff]  ;;  %v3196_v61 = vpack.c.bf16 %v2370_v51, %v2369_v50  ;;  %v2411_v51 = vld [vmem:[#allocation7 + $0x150] sm:$0xff] }
 0x121   :  { %2982 = vmatpush3.bf16.msra.mxu0 %v3671_v62  ;;  %3004 = vmatpush3.bf16.msra.mxu1 %v3672_v63  ;;  %v3228_v62 = vpack.c.bf16 %v2402_v56, %v2401_v55  ;;  %v2371_v63 = vld [vmem:[#allocation7 + $0x10] sm:$0xff]  ;;  %v2398_v55 = vld [vmem:[#allocation7 + $0xe8] sm:$0xff]  ;;  %v2429_v56 = vld [vmem:[#allocation7 + $0x1e0] sm:$0xff] }
 0x122   :  { %2983 = vmatprep.subr.bf16.mxu0 %v3673_v0  ;;  %3005 = vmatprep.subr.bf16.mxu1 %v3674_v1  ;;  %v2372_v0 = vld [vmem:[#allocation7 + $0x18] sm:$0xff]  ;;  %v3198_v1 = vpack.c.bf16 %v2388_v58, %v2387_v57  ;;  %v2430_v57 = vld [vmem:[#allocation7 + $0x1e8] sm:$0xff] }
 0x125   :  { %2984 = vmatpush3.bf16.msra.mxu0 %v3675_v2  ;;  %3006 = vmatpush3.bf16.msra.mxu1 %v3676_v3  ;;  %v3230_v2 = vpack.c.bf16 %v2420_v60, %v2419_v59  ;;  %v2403_v3 = vld [vmem:[#allocation7 + $0x110] sm:$0xff]  ;;  %v2381_v60 = vld [vmem:[#allocation7 + $0x60] sm:$0xff] }
 0x126   :  { %2985 = vmatprep.subr.bf16.mxu0 %v3677_v4  ;;  %3007 = vmatprep.subr.bf16.mxu1 %v3678_v6  ;;  %v2404_v4 = vld [vmem:[#allocation7 + $0x118] sm:$0xff]  ;;  %v2389_v6 = vld [vmem:[#allocation7 + $0xa0] sm:$0xff] }
 0x129   :  { %2986 = vmatpush3.bf16.msra.mxu0 %v3679_v48  ;;  %3008 = vmatpush3.bf16.msra.mxu1 %v3680_v30  ;;  %v2390_v48 = vld [vmem:[#allocation7 + $0xa8] sm:$0xff]  ;;  %v2421_v30 = vld [vmem:[#allocation7 + $0x1a0] sm:$0xff] }
 0x12a   :  { %2987 = vmatprep.subr.bf16.mxu0 %v3681_v7  ;;  %3009 = vmatprep.subr.bf16.mxu1 %v3682_v8  ;;  %v2422_v7 = vld [vmem:[#allocation7 + $0x1a8] sm:$0xff]  ;;  %v3200_v8 = vpack.c.bf16 %v2372_v0, %v2371_v63  ;;  %v3250_v63 = vpack.c.bf16 %v2430_v57, %v2429_v56  ;;  %v2413_v0 = vld [vmem:[#allocation7 + $0x160] sm:$0xff] }
 0x12d   :  { %2988 = vmatpush3.bf16.msra.mxu0 %v3683_v10  ;;  %3010 = vmatpush3.bf16.msra.mxu1 %v3684_v11  ;;  %v3232_v10 = vpack.c.bf16 %v2404_v4, %v2403_v3  ;;  %v2373_v11 = vld [vmem:[#allocation7 + $0x20] sm:$0xff]  ;;  %v2400_v3 = vld [vmem:[#allocation7 + $0xf8] sm:$0xff]  ;;  %v2431_v4 = vld [vmem:[#allocation7 + $0x1f0] sm:$0xff] }
 0x12e   :  { %2989 = vmatprep.subr.bf16.mxu0 %v3685_v12  ;;  %3011 = vmatprep.subr.bf16.mxu1 %v3686_v14  ;;  %v2374_v12 = vld [vmem:[#allocation7 + $0x28] sm:$0xff]  ;;  %v3202_v14 = vpack.c.bf16 %v2390_v48, %v2389_v6  ;;  %v2432_v6 = vld [vmem:[#allocation7 + $0x1f8] sm:$0xff] }
 0x131   :  { %2990 = vmatpush3.bf16.msra.mxu0 %v3687_v16  ;;  %3012 = vmatpush3.bf16.msra.mxu1 %v3688_v17  ;;  %v3234_v16 = vpack.c.bf16 %v2422_v7, %v2421_v30  ;;  %v2405_v17 = vld [vmem:[#allocation7 + $0x120] sm:$0xff]  ;;  %v2383_v7 = vld [vmem:[#allocation7 + $0x70] sm:$0xff] }
 0x132   :  { %2991 = vmatprep.subr.bf16.mxu0 %v3689_v18  ;;  %3013 = vmatprep.subr.bf16.mxu1 %v3690_v20  ;;  %v2406_v18 = vld [vmem:[#allocation7 + $0x128] sm:$0xff]  ;;  %v2391_v20 = vld [vmem:[#allocation7 + $0xb0] sm:$0xff] }
 0x135   :  { %2992 = vmatpush3.bf16.msra.mxu0 %v3691_v21  ;;  %3014 = vmatpush3.bf16.msra.mxu1 %v3692_v22  ;;  %v2392_v21 = vld [vmem:[#allocation7 + $0xb8] sm:$0xff]  ;;  %v2423_v22 = vld [vmem:[#allocation7 + $0x1b0] sm:$0xff] }
 0x136   :  { %3021 = vmatprep.subr.bf16.mxu0 %v3693_v23  ;;  %3139 = vmatprep.subr.bf16.mxu1 %v3823_v13  ;;  %v2424_v23 = vld [vmem:[#allocation7 + $0x1b8] sm:$0xff] }
 0x138   :  { %2237 = vmatmul.mubr.bf16.vlgmr.msra.gmra.mrb[4].mxu0 %v3887_v5  ;;  %2277 = vmatmul.mubr.bf16.vlgmr.msra.gmra.mrb[4].mxu1 %v3901_v9  ;;  %v3701_v5 = vld [vmem:[#allocation5 + $0x7e0] ss:$20 sps:$4 sm:$0xff]   ;;  %v3702_v9 = vld [vmem:[#allocation5 + $0x6c8] ss:$20 sps:$4 sm:$0xff]  }
 0x139   :  { %3022 = vmatpush3.bf16.msra.mxu0 %v3694_v24  ;;  %3140 = vmatpush3.bf16.msra.mxu1 %v3695_v25  ;;  %v2375_v24 = vld [vmem:[#allocation7 + $0x30] sm:$0xff]  ;;  %v2376_v25 = vld [vmem:[#allocation7 + $0x38] sm:$0xff] }
 0x13a   :  { %3023 = vmatprep.subr.bf16.mxu0 %v3696_v26  ;;  %3141 = vmatprep.subr.bf16.mxu1 %v3823_v13  ;;  %v3206_v26 = vpack.c.bf16 %v2392_v21, %v2391_v20  ;;  %v2433_v20 = vld [vmem:[#allocation7 + $0x200] sm:$0xff]  ;;  %v2434_v21 = vld [vmem:[#allocation7 + $0x208] sm:$0xff] }
 0x13b   :  { %2316 = vmatprep.mubr.bf16.mxu0 %v3907_v15  ;;  %3155 = vmatprep.mubr.msk.bf16.mxu1 %vm3824_vm0, %v3823_v13  ;;  %v3705_v15 = vld [vmem:[#allocation5 + $0x6f0] ss:$20 sps:$4 sm:$0xff]  }
 0x13d   :  { %3024 = vmatpush3.bf16.msra.mxu0 %v3697_v27  ;;  %3142 = vmatpush3.bf16.msra.mxu1 %v3698_v28  ;;  %v3238_v27 = vpack.c.bf16 %v2424_v23, %v2423_v22  ;;  %v2407_v28 = vld [vmem:[#allocation7 + $0x130] sm:$0xff] }
 0x13e   :  { %3025 = vmatprep.subr.bf16.mxu0 %v3699_v29  ;;  %3143 = vmatprep.subr.bf16.mxu1 %v3823_v13  ;;  %v2408_v29 = vld [vmem:[#allocation7 + $0x138] sm:$0xff] }
 0x141   :  { %3026 = vmatpush3.bf16.msra.mxu0 %v3700_v31  ;;  %3144 = vmatpush3.bf16.msra.mxu1 %v3701_v5  ;;  %v2393_v31 = vld [vmem:[#allocation7 + $0xc0] sm:$0xff]  ;;  %v2394_v5 = vld [vmem:[#allocation7 + $0xc8] sm:$0xff] }
 0x142   :  { %3027 = vmatprep.subr.bf16.mxu0 %v3702_v9  ;;  %3145 = vmatprep.subr.bf16.mxu1 %v3823_v13  ;;  %v2425_v9 = vld [vmem:[#allocation7 + $0x1c0] sm:$0xff] }
 0x145   :  { %3028 = vmatpush3.bf16.msra.mxu0 %v3703_v32  ;;  %3146 = vmatpush3.bf16.msra.mxu1 %v3704_v33  ;;  %v2426_v32 = vld [vmem:[#allocation7 + $0x1c8] sm:$0xff]  ;;  %v3208_v33 = vpack.c.bf16 %v2376_v25, %v2375_v24 }
 0x146   :  { %3029 = vmatprep.subr.bf16.mxu0 %v3705_v15  ;;  %3147 = vmatprep.subr.bf16.mxu1 %v3823_v13  ;;  %v3240_v15 = vpack.c.bf16 %v2408_v29, %v2407_v28  ;;  %v3259_v28 = vpack.c.bf16 %v2434_v21, %v2433_v20 }
 0x149   :  { %3030 = vmatpush3.bf16.msra.mxu0 %v3706_v34  ;;  %3148 = vmatpush3.bf16.msra.mxu1 %v3707_v35  ;;  %v2377_v34 = vld [vmem:[#allocation7 + $0x40] sm:$0xff]  ;;  %v2378_v35 = vld [vmem:[#allocation7 + $0x48] sm:$0xff] }
 0x14a   :  { %3031 = vmatprep.subr.bf16.mxu0 %v3708_v36  ;;  %3149 = vmatprep.subr.bf16.mxu1 %v3823_v13  ;;  %v3210_v36 = vpack.c.bf16 %v2394_v5, %v2393_v31  ;;  %v3212_v44 = vpack.c.bf16 %v2378_v35, %v2377_v34  ;;  %v2437_v34 = vld [vmem:[#allocation7 + $0x220] sm:$0xff]  ;;  %v2438_v35 = vld [vmem:[#allocation7 + $0x228] sm:$0xff] }
 0x14d   :  { %3032 = vmatpush3.bf16.msra.mxu0 %v3709_v37  ;;  %3150 = vmatpush3.bf16.msra.mxu1 %v3710_v38  ;;  %v3242_v37 = vpack.c.bf16 %v2426_v32, %v2425_v9  ;;  %v2409_v38 = vld [vmem:[#allocation7 + $0x140] sm:$0xff]  ;;  %v2435_v32 = vld [vmem:[#allocation7 + $0x210] sm:$0xff] }
 0x14e   :  { %3033 = vmatprep.subr.bf16.mxu0 %v3711_v39  ;;  %3151 = vmatprep.subr.bf16.mxu1 %v3823_v13  ;;  %v2410_v39 = vld [vmem:[#allocation7 + $0x148] sm:$0xff] }
 0x14f   :  { %v3244_v45 = vpack.c.bf16 %v2410_v39, %v2409_v38  ;;  %v2440_v38 = vld [vmem:[#allocation7 + $0x238] sm:$0xff] }
 0x151   :  { %3034 = vmatpush3.bf16.msra.mxu0 %v3712_v40  ;;  %3152 = vmatpush3.bf16.msra.mxu1 %v3713_v41  ;;  %v2395_v40 = vld [vmem:[#allocation7 + $0xd0] sm:$0xff]  ;;  %v2396_v41 = vld [vmem:[#allocation7 + $0xd8] sm:$0xff] }
 0x152   :  { %3035 = vmatprep.subr.bf16.mxu0 %v3714_v42  ;;  %3153 = vmatprep.subr.bf16.mxu1 %v3823_v13  ;;  %v2427_v42 = vld [vmem:[#allocation7 + $0x1d0] sm:$0xff] }
 0x153   :  { %v3246_v50 = vpack.c.bf16 %v2428_v43, %v2427_v42  ;;  %v2443_v43 = vld [vmem:[#allocation7 + $0x250] sm:$0xff] }
 0x155   :  { %3036 = vmatpush3.bf16.msra.mxu0 %v3715_v47  ;;  %3154 = vmatpush3.bf16.msra.mxu1 %v3716_v49  ;;  %v2380_v47 = vld [vmem:[#allocation7 + $0x58] sm:$0xff]  ;;  %v3214_v49 = vpack.c.bf16 %v2396_v41, %v2395_v40  ;;  %v2441_v40 = vld [vmem:[#allocation7 + $0x240] sm:$0xff]  ;;  %v2442_v41 = vld [vmem:[#allocation7 + $0x248] sm:$0xff] }
 0x156   :  { %3195 = vmatprep.subr.bf16.mxu0 %v3194_v52  ;;  %3227 = vmatprep.subr.bf16.mxu1 %v3226_v54  ;;  %v2412_v52 = vld [vmem:[#allocation7 + $0x158] sm:$0xff]  ;;  %v2397_v54 = vld [vmem:[#allocation7 + $0xe0] sm:$0xff]  ;;  %v3216_v58 = vpack.c.bf16 %v2380_v47, %v2379_v46  ;;  %v3271_v42 = vpack.c.bf16 %v2442_v41, %v2441_v40  ;;  %v2446_v46 = vld [vmem:[#allocation7 + $0x268] sm:$0xff] }
 0x157   :  { %v3248_v59 = vpack.c.bf16 %v2412_v52, %v2411_v51 }
 0x158   :  { %2317 = vmatmul.mubr.bf16.vlgmr.msra.gmra.mrb[8].mxu0 %v3915_v19  ;;  %3156 = vmatmul.mubr.bf16.vlgmr.msra.gmra.mrb[8].mxu1 %v3919_v53  ;;  %v3204_v19 = vpack.c.bf16 %v2374_v12, %v2373_v11  ;;  %v3236_v53 = vpack.c.bf16 %v2406_v18, %v2405_v17  ;;  %v2384_v11 = vld [vmem:[#allocation7 + $0x78] sm:$0xff]  ;;  %v2415_v12 = vld [vmem:[#allocation7 + $0x170] sm:$0xff]  ;;  %v3825_v18 = vmov 0.0|0.0  }
 0x159   :  { %3197 = vmatpush3.bf16.msra.mxu0 %v3196_v61  ;;  %3229 = vmatpush3.bf16.msra.mxu1 %v3228_v62  ;;  %v2382_v61 = vld [vmem:[#allocation7 + $0x68] sm:$0xff]  ;;  %v3218_v62 = vpack.c.bf16 %v2398_v55, %v2397_v54 }
 0x15a   :  { %3199 = vmatprep.subr.bf16.mxu0 %v3198_v1  ;;  %3231 = vmatprep.subr.bf16.mxu1 %v3230_v2  ;;  %v2414_v1 = vld [vmem:[#allocation7 + $0x168] sm:$0xff]  ;;  %v2399_v2 = vld [vmem:[#allocation7 + $0xf0] sm:$0xff]  ;;  %v3220_v48 = vpack.c.bf16 %v2382_v61, %v2381_v60 }
 0x15b   :  { %v3252_v30 = vpack.c.bf16 %v2414_v1, %v2413_v0 }
 0x15d   :  { %3201 = vmatpush3.bf16.msra.mxu0 %v3200_v8  ;;  %3233 = vmatpush3.bf16.msra.mxu1 %v3232_v10  ;;  %v3222_v8 = vpack.c.bf16 %v2400_v3, %v2399_v2  ;;  %v3254_v10 = vpack.c.bf16 %v2432_v6, %v2431_v4 }
 0x15e   :  { %3203 = vmatprep.subr.bf16.mxu0 %v3202_v14  ;;  %3235 = vmatprep.subr.bf16.mxu1 %v3234_v16  ;;  %v2416_v14 = vld [vmem:[#allocation7 + $0x178] sm:$0xff]  ;;  %v3224_v16 = vpack.c.bf16 %v2384_v11, %v2383_v7 }
 0x15f   :  { %v3256_v17 = vpack.c.bf16 %v2416_v14, %v2415_v12 }
 0x161   :  { %3205 = vmatpush3.bf16.msra.mxu0 %v3204_v19  ;;  %3237 = vmatpush3.bf16.msra.mxu1 %v3236_v53 }
 0x162   :  { %3207 = vmatprep.subr.bf16.mxu0 %v3206_v26  ;;  %3239 = vmatprep.subr.bf16.mxu1 %v3238_v27 }
 0x165   :  { %3209 = vmatpush3.bf16.msra.mxu0 %v3208_v33  ;;  %3241 = vmatpush3.bf16.msra.mxu1 %v3240_v15  ;;  %v2436_v33 = vld [vmem:[#allocation7 + $0x218] sm:$0xff] }
 0x166   :  { %3211 = vmatprep.subr.bf16.mxu0 %v3210_v36  ;;  %3243 = vmatprep.subr.bf16.mxu1 %v3242_v37  ;;  %v3262_v15 = vpack.c.bf16 %v2436_v33, %v2435_v32  ;;  %v3265_v36 = vpack.c.bf16 %v2438_v35, %v2437_v34  ;;  %v2439_v37 = vld [vmem:[#allocation7 + $0x230] sm:$0xff] }
 0x167   :  { %v3268_v39 = vpack.c.bf16 %v2440_v38, %v2439_v37 }
 0x169   :  { %3213 = vmatpush3.bf16.msra.mxu0 %v3212_v44  ;;  %3245 = vmatpush3.bf16.msra.mxu1 %v3244_v45  ;;  %v2444_v44 = vld [vmem:[#allocation7 + $0x258] sm:$0xff]  ;;  %v2445_v45 = vld [vmem:[#allocation7 + $0x260] sm:$0xff] }
 0x16a   :  { %3215 = vmatprep.subr.bf16.mxu0 %v3214_v49  ;;  %3247 = vmatprep.subr.bf16.mxu1 %v3246_v50  ;;  %v3277_v47 = vpack.c.bf16 %v2446_v46, %v2445_v45  ;;  %v2447_v49 = vld [vmem:[#allocation7 + $0x270] sm:$0xff]  ;;  %v2448_v50 = vld [vmem:[#allocation7 + $0x278] sm:$0xff] }
 0x16b   :  { %v3280_v51 = vpack.c.bf16 %v2448_v50, %v2447_v49 }
 0x16d   :  { %3217 = vmatpush3.bf16.msra.mxu0 %v3216_v58  ;;  %3249 = vmatpush3.bf16.msra.mxu1 %v3248_v59 }
 0x16e   :  { %3219 = vmatprep.subr.bf16.mxu0 %v3218_v62  ;;  %3251 = vmatprep.subr.bf16.mxu1 %v3250_v63 }
 0x171   :  { %3221 = vmatpush3.bf16.msra.mxu0 %v3220_v48  ;;  %3253 = vmatpush3.bf16.msra.mxu1 %v3252_v30 }
 0x172   :  { %3223 = vmatprep.subr.bf16.mxu0 %v3222_v8  ;;  %3255 = vmatprep.subr.bf16.mxu1 %v3254_v10 }
 0x175   :  { %3225 = vmatpush3.bf16.msra.mxu0 %v3224_v16  ;;  %3257 = vmatpush3.bf16.msra.mxu1 %v3256_v17 }
 0x176   :  { %3258 = vmatprep.subr.bf16.mxu0 %v3825_v18 }
 0x1eb   :  { %v2033_v22 = vpop.f32.mrb[0].mxu0  ;;  %v2197_v23 = vpop.f32.mrb[0].mxu1 }
 0x1ec   :  { %v2035_v19 = vpop.f32.mrb[1].mxu0  ;;  %v2199_v53 = vpop.f32.mrb[1].mxu1  ;;  %v2364_v29 = vmax.f32 %v2033_v22, 0.0  ;;  %v2366_v31 = vmax.f32 %v2197_v23, 0.0  ;;  %v2659_v22 = vlaneseq }
 0x1ed   :  { %v2365_v24 = vmax.f32 %v2035_v19, 0.0  ;;  %v2367_v25 = vmax.f32 %v2199_v53, 0.0  ;;  %v2037_v26 = vpop.f32.mrb[2].mxu0  ;;  %v2201_v27 = vpop.f32.mrb[2].mxu1 }
 0x1ee   :  { %v2038_v5 = vpop.f32.mrb[3].mxu0  ;;  %v2202_v9 = vpop.f32.mrb[3].mxu1  ;;  %v2660_v23 = vand.u32 127, %v2659_v22 }
 0x1ef   :  { %2513 = vmatprep.mubr.f32.mxu0 %v2365_v24  ;;  %2583 = vmatprep.mubr.f32.mxu1 %v2367_v25 }
 0x1f0   :  { %2514 = vmatmul.mubr.f32.vlgmr.msra.gmra.mrb[12].mxu0 %v2364_v29  ;;  %2584 = vmatmul.mubr.f32.vlgmr.msra.gmra.mrb[12].mxu1 %v2366_v31  ;;  %vm2661_vm1 = vcmp.lt.s32.totalorder %v2660_v23, 2 }
 0x1f1   :  { %3260 = vmatpush3.bf16.msra.mxu0 %v3259_v28  ;;  %3191 = vmatprep.mubr.msk.f32.mxu0 %vm3824_vm0, %v3823_v13  ;;  %v3274_v13 = vpack.c.bf16 %v2444_v44, %v2443_v43 }
 0x1f2   :  { %3261 = vmatprep.subr.bf16.mxu0 %v3825_v18 }
 0x1f5   :  { %3263 = vmatpush3.bf16.msra.mxu0 %v3262_v15 }
 0x1f6   :  { %3264 = vmatprep.subr.bf16.mxu0 %v3825_v18 }
 0x1f9   :  { %3266 = vmatpush3.bf16.msra.mxu0 %v3265_v36 }
 0x1fa   :  { %3267 = vmatprep.subr.bf16.mxu0 %v3825_v18 }
 0x1fd   :  { %3269 = vmatpush3.bf16.msra.mxu0 %v3268_v39 }
 0x1fe   :  { %3270 = vmatprep.subr.bf16.mxu0 %v3825_v18 }
 0x201   :  { %3272 = vmatpush3.bf16.msra.mxu0 %v3271_v42 }
 0x202   :  { %3273 = vmatprep.subr.bf16.mxu0 %v3825_v18 }
 0x205   :  { %3275 = vmatpush3.bf16.msra.mxu0 %v3274_v13 }
 0x206   :  { %3276 = vmatprep.subr.bf16.mxu0 %v3825_v18 }
 0x209   :  { %3278 = vmatpush3.bf16.msra.mxu0 %v3277_v47 }
 0x20a   :  { %3279 = vmatprep.subr.bf16.mxu0 %v3825_v18 }
 0x20b   :  { %v2993_v52 = vpop.f32.mrb[4].mxu0  ;;  %v3015_v54 = vpop.f32.mrb[4].mxu1 }
 0x20c   :  { %v2994_v55 = vpop.f32.mrb[5].mxu0  ;;  %v3016_v56 = vpop.f32.mrb[5].mxu1 }
 0x20d   :  { %v2995_v57 = vadd.f32 %v2994_v55, %v2993_v52  ;;  %v3017_v58 = vadd.f32 %v3016_v56, %v3015_v54  ;;  %v2996_v59 = vpop.f32.mrb[6].mxu0  ;;  %v3018_v60 = vpop.f32.mrb[6].mxu1  ;;  %3281 = vmatpush3.bf16.msra.mxu0 %v3280_v51 }
 0x20e   :  { %v2997_v61 = vpop.f32.mrb[7].mxu0  ;;  %v3019_v62 = vpop.f32.mrb[7].mxu1 }
 0x20f   :  { %v2279_v63 = vadd.f32 %v3017_v58, %v2995_v57 }
 0x22b   :  { %v3037_v0 = vpop.f32.mrb[8].mxu0  ;;  %v2358_v1 = vpop.f32.mrb[8].mxu1 }
 0x22c   :  { %v3038_v2 = vpop.f32.mrb[9].mxu0  ;;  %v3157_v3 = vpop.f32.mrb[9].mxu1 }
 0x22d   :  { %v3039_v4 = vadd.f32 %v3038_v2, %v3037_v0  ;;  %v3040_v6 = vpop.f32.mrb[10].mxu0  ;;  %v2361_v48 = vpop.f32.mrb[10].mxu1 }
 0x22e   :  { %v3041_v30 = vpop.f32.mrb[11].mxu0  ;;  %v3158_v7 = vpop.f32.mrb[11].mxu1 }
 0x22f   :  { %v2319_v8 = vadd.f32 %v3039_v4, %v2279_v63 }
 0x231   :  { %v2359_v10 = vadd.f32 %v2358_v1, %v2319_v8 }
 0x233   :  { %v2368_v11 = vmax.f32 %v2359_v10, 0.0 }
 0x235   :  { %3192 = vmatmul.mubr.f32.vlgmr.msra.gmra.mrb[14].mxu0 %v2368_v11 }
 0x2c3   :  { %v3084_v12 = vpop.f32.mrb[12].mxu0  ;;  %v3119_v14 = vpop.f32.mrb[12].mxu1 }
 0x2c4   :  { %v3085_v16 = vpop.f32.mrb[13].mxu0  ;;  %v3120_v17 = vpop.f32.mrb[13].mxu1 }
 0x2c5   :  { %v3086_v18 = vadd.f32 %v3085_v16, %v3084_v12  ;;  %v3121_v20 = vadd.f32 %v3120_v17, %v3119_v14 }
 0x2c7   :  { %v2586_v21 = vadd.f32 %v3121_v20, %v3086_v18 }
 0x308   :  { %v2655_v19 = vpop.f32.mrb[14].mxu0 }
 0x309   :  { %v2656_v53 = vadd.f32 %v2655_v19, %v2586_v21  ;;  %v3193_v24 = vpop.f32.mrb[15].mxu0 }
 0x30b   :  { %v2662_v25 = vsel %vm2661_vm1, %v2656_v53, -1e+30 }
 0x30c   :  { %2663 = vmax.xlane.f32.xlu0 %v2662_v25 }
 0x399   :  { %v2664_v26 = vpop.xlane.xlu0 %2663 }
 0x39a   :  { %v2665_v27 = vsub.f32 %v2662_v25, %v2664_v26 }
 0x39c   :  { %v2666_v28 = vmul.f32 1.442695, %v2665_v27 }
 0x39e   :  { %3717 = vpow2.f32 %v2666_v28 }
 0x3a8   :  { %v3718_v29 = vpop.eup %3717 }
 0x3a9   :  { %2668 = vadd.xlane.f32.xlu0 %v3718_v29 }
 0x436   :  { %v2669_v31 = vpop.xlane.xlu0 %2668 }
 0x437   :  { %3719 = vlog2.f32 %v2669_v31 }
 0x441   :  { %v3720_v5 = vpop.eup %3719 }
 0x442   :  { %v2671_v9 = vmul.f32 0.6931472, %v3720_v5 }
 0x444   :  { %v2672_v32 = vsub.f32 %v2665_v27, %v2671_v9 }
 0x446   :  { %2673 = vst [vmem:[#allocation8] sm:$0xff] %v2672_v32 }
 0x447   :  { %3798 = shalt.err (!%p3795_p0)
}
 0x448   :  { %s3799_s27 = scalar_lea.hbm %s3957_s3, 128 }
 0x449   :  { %p3800_p1 = scmp.ne.s32.totalorder %s3957_s3, %s3799_s27  ;;  %p3803_p2 = scmp.lt.u32.totalorder %s3799_s27, %s3957_s3 }
 0x44b   :  { %p3805_p3 = pnand %p3803_p2, %p3800_p1 }
 0x44d   :  { %3808 = shalt.err (!%p3805_p3)
}
 0x44e   :  { %2683 = dma.vmem_to_hbm [thread:$0]  %s2681_s23, 128, %s3957_s3, [#allocation4]  }
 0x44f   :  { %3813 = dma.done.wait [#allocation4], 128  }
 0x450   :  { %3814 = vsyncadd [#allocation4], 4294967168 }
 0x451   :  { %2687 = vsyncpa [#allocation3], 1 }
 0x452   :  { %2688 = vsyncpa [#allocation6], 1 }
 0x453   :  { %2689 = vsyncpa [#allocation4], 1 }

</bundles_post_ra>
